<compile_context>
chip_gen: v7x
topology: tpu7x:2x2x1
jax: 0.10.0
libtpu: 0.0.40
codegen_flags: <defaults>
</compile_context>

<pallas_src>
import functools

import jax
import jax.numpy as jnp
from jax.experimental import pallas as pl
from jax.experimental.pallas import tpu as pltpu


# ------------------------- Pallas kernel -------------------------

def encoder_stack_kernel(src_ref,
                         wqkv_ref, bqkv_ref, wo_ref, bo_ref,
                         ln1g_ref, ln1b_ref,
                         w1_ref, b1_ref, w2_ref, b2_ref,
                         ln2g_ref, ln2b_ref,
                         out_ref, act_ref,
                         *, n_heads, head_dim, eps):
    l = pl.program_id(1)
    n_layers = pl.num_programs(1)

    # Load the embedded input into the resident activation buffer at layer 0.
    @pl.when(l == 0)
    def _init():
        act_ref[...] = src_ref[0]

    x = act_ref[...]                                   # (S, H) float32
    hidden = x.shape[-1]
    xb = x.astype(jnp.bfloat16)

    # ---- fused QKV projection (single MXU pass) ----
    qkv = jnp.dot(xb, wqkv_ref[0],
                  preferred_element_type=jnp.float32) + bqkv_ref[0]   # (S, 3H) f32

    inv_scale = 1.0 / (float(head_dim) ** 0.5)
    wo = wo_ref[0]                                     # (n_heads, d, H) bf16
    attn_out = None
    for h in range(n_heads):                           # static unroll, no concat
        lo = h * head_dim
        qh = qkv[:, lo:lo + head_dim].astype(jnp.bfloat16)
        kh = qkv[:, hidden + lo:hidden + lo + head_dim].astype(jnp.bfloat16)
        vh = qkv[:, 2 * hidden + lo:2 * hidden + lo + head_dim].astype(jnp.bfloat16)

        # energy = q @ k^T  (contract the head dim of both operands)
        energy = jax.lax.dot_general(
            qh, kh, (((1,), (1,)), ((), ())),
            preferred_element_type=jnp.float32) * inv_scale           # (S, S)
        energy = energy - jnp.max(energy, axis=-1, keepdims=True)
        p = jnp.exp(energy)
        denom = jnp.sum(p, axis=-1, keepdims=True)
        attn = p * pl.reciprocal(denom, approx=True)                  # softmax

        oh = jnp.dot(attn.astype(jnp.bfloat16), vh,
                     preferred_element_type=jnp.float32)              # (S, d)
        contrib = jnp.dot(oh.astype(jnp.bfloat16), wo[h],
                          preferred_element_type=jnp.float32)         # (S, H)
        attn_out = contrib if attn_out is None else attn_out + contrib
    attn_out = attn_out + bo_ref[0]

    # ---- residual + LayerNorm 1 (f32) ----
    y = x + attn_out
    mu = jnp.mean(y, axis=-1, keepdims=True)
    var = jnp.mean((y - mu) ** 2, axis=-1, keepdims=True)
    y = (y - mu) * jax.lax.rsqrt(var + eps) * ln1g_ref[0] + ln1b_ref[0]

    # ---- position-wise feedforward (bf16 matmuls, f32 accumulation) ----
    h1 = jnp.dot(y.astype(jnp.bfloat16), w1_ref[0],
                 preferred_element_type=jnp.float32) + b1_ref[0]
    h1 = jnp.maximum(h1, 0.0)
    ff = jnp.dot(h1.astype(jnp.bfloat16), w2_ref[0],
                 preferred_element_type=jnp.float32) + b2_ref[0]

    # ---- residual + LayerNorm 2 (f32) ----
    z = y + ff
    mu2 = jnp.mean(z, axis=-1, keepdims=True)
    var2 = jnp.mean((z - mu2) ** 2, axis=-1, keepdims=True)
    z = (z - mu2) * jax.lax.rsqrt(var2 + eps) * ln2g_ref[0] + ln2b_ref[0]

    act_ref[...] = z                                    # stays resident across layers

    @pl.when(l == n_layers - 1)
    def _finalize():
        out_ref[0] = z


# ------------------------- wrappers -------------------------

def stack_layer_params(params, n_heads):
    """Stack per-layer params along a leading layer axis; fuse QKV; cast weights to bf16."""
    layers = params['layers']
    n_layers = len(layers)
    hidden = layers[0]['wq'].shape[0]
    head_dim = hidden // n_heads

    def st(name):
        return jnp.stack([lp[name] for lp in layers], axis=0)

    return {
        'wqkv': jnp.concatenate([st('wq'), st('wk'), st('wv')],
                                axis=-1).astype(jnp.bfloat16),            # (L, H, 3H)
        'bqkv': jnp.concatenate([st('bq'), st('bk'), st('bv')], axis=-1),  # (L, 1, 3H)
        'wo': st('wo').reshape(n_layers, n_heads, head_dim,
                               hidden).astype(jnp.bfloat16),               # (L, nH, d, H)
        'bo': st('bo'),                                                    # (L, 1, H)
        'ln1_g': st('ln1_g'), 'ln1_b': st('ln1_b'),
        'w1': st('w1').astype(jnp.bfloat16), 'b1': st('b1'),
        'w2': st('w2').astype(jnp.bfloat16), 'b2': st('b2'),
        'ln2_g': st('ln2_g'), 'ln2_b': st('ln2_b'),
    }


def run_encoder_stack(src, stacked, *, n_heads):
    B, S, H = src.shape
    n_layers = stacked['wqkv'].shape[0]
    head_dim = H // n_heads

    kernel = functools.partial(encoder_stack_kernel,
                               n_heads=n_heads, head_dim=head_dim, eps=1e-5)

    def layer_spec(shape):
        nd = len(shape)
        return pl.BlockSpec((1,) + tuple(shape[1:]),
                            lambda b, l, _nd=nd: (l,) + (0,) * (_nd - 1))

    in_specs = [
        pl.BlockSpec((1, S, H), lambda b, l: (b, 0, 0)),   # src (read at l == 0)
        layer_spec(stacked['wqkv'].shape),
        layer_spec(stacked['bqkv'].shape),
        layer_spec(stacked['wo'].shape),
        layer_spec(stacked['bo'].shape),
        layer_spec(stacked['ln1_g'].shape),
        layer_spec(stacked['ln1_b'].shape),
        layer_spec(stacked['w1'].shape),
        layer_spec(stacked['b1'].shape),
        layer_spec(stacked['w2'].shape),
        layer_spec(stacked['b2'].shape),
        layer_spec(stacked['ln2_g'].shape),
        layer_spec(stacked['ln2_b'].shape),
    ]
    args = [src,
            stacked['wqkv'], stacked['bqkv'], stacked['wo'], stacked['bo'],
            stacked['ln1_g'], stacked['ln1_b'],
            stacked['w1'], stacked['b1'], stacked['w2'], stacked['b2'],
            stacked['ln2_g'], stacked['ln2_b']]

    return pl.pallas_call(
        kernel,
        out_shape=jax.ShapeDtypeStruct((B, S, H), jnp.float32),
        grid=(B, n_layers),
        in_specs=in_specs,
        out_specs=pl.BlockSpec((1, S, H), lambda b, l: (b, 0, 0)),
        scratch_shapes=[pltpu.VMEM((S, H), jnp.float32)],
        compiler_params=pltpu.CompilerParams(
            dimension_semantics=("parallel", "arbitrary"),
            vmem_limit_bytes=32 * 1024 * 1024),
    )(*args)


def encoder_forward(tokens, params, *, n_heads, return_cls):
    B, S = tokens.shape
    H = params['tok_embedding'].shape[1]

    # Embedding gathers + combine in plain JAX (XLA fuses the elementwise op).
    scale = float(H) ** 0.5
    tok_emb = jnp.take(params['tok_embedding'], tokens, axis=0) * scale   # (B, S, H)
    pos_emb = jnp.take(params['pos_embedding'], jnp.arange(S), axis=0)    # (S, H)
    src = (tok_emb + pos_emb[None]).astype(jnp.float32)

    stacked = stack_layer_params(params, n_heads)
    src = run_encoder_stack(src, stacked, n_heads=n_heads)

    cls = src[:, 0, :]
    end = src[:, -1, :]
    if return_cls:
        cls = cls[:, None, :]
        end = end[:, None, :]
    return cls, end


# ------------------------- pure-JAX reference (mirrors bf16-at-dot-boundary) -------------------------

def _bdot(a, w):
    return jnp.dot(a.astype(jnp.bfloat16), w.astype(jnp.bfloat16),
                   preferred_element_type=jnp.float32)


def _ref_layer(x, p, n_heads):
    B, S, H = x.shape
    d = H // n_heads

    q = _bdot(x, p['wq']) + p['bq']
    k = _bdot(x, p['wk']) + p['bk']
    v = _bdot(x, p['wv']) + p['bv']
    q = q.reshape(B, S, n_heads, d).transpose(0, 2, 1, 3).astype(jnp.bfloat16)
    k = k.reshape(B, S, n_heads, d).transpose(0, 2, 1, 3).astype(jnp.bfloat16)
    v = v.reshape(B, S, n_heads, d).transpose(0, 2, 1, 3).astype(jnp.bfloat16)
    energy = jnp.einsum('bhqd,bhkd->bhqk', q, k,
                        preferred_element_type=jnp.float32) / jnp.sqrt(jnp.float32(d))
    attn = jax.nn.softmax(energy, axis=-1)
    o = jnp.einsum('bhqk,bhkd->bhqd', attn.astype(jnp.bfloat16), v,
                   preferred_element_type=jnp.float32)
    o = o.transpose(0, 2, 1, 3).reshape(B, S, H)
    o = _bdot(o, p['wo']) + p['bo']

    def ln(a, g, b):
        mu = a.mean(-1, keepdims=True)
        var = ((a - mu) ** 2).mean(-1, keepdims=True)
        return (a - mu) * jax.lax.rsqrt(var + 1e-5) * g[0] + b[0]

    y = ln(x + o, p['ln1_g'], p['ln1_b'])
    ff = _bdot(jnp.maximum(_bdot(y, p['w1']) + p['b1'], 0.0), p['w2']) + p['b2']
    return ln(y + ff, p['ln2_g'], p['ln2_b'])


def _ref_encoder(tokens, params, n_heads, return_cls):
    B, S = tokens.shape
    H = params['tok_embedding'].shape[1]
    tok = jnp.take(params['tok_embedding'], tokens, axis=0) * (float(H) ** 0.5)
    pos = jnp.take(params['pos_embedding'], jnp.arange(S), axis=0)[None]
    src = tok + pos
    for lp in params['layers']:
        src = _ref_layer(src, lp, n_heads)
    cls, end = src[:, 0, :], src[:, -1, :]
    if return_cls:
        cls, end = cls[:, None, :], end[:, None, :]
    return cls, end


# ------------------------- parameter init -------------------------

def init_params(key, *, input_dim, hidden_dim, n_layers, pf_dim, max_length):
    keys = jax.random.split(key, 2 + n_layers)
    params = {
        'tok_embedding': jax.random.normal(keys[0], (input_dim, hidden_dim),
                                           jnp.float32) * 0.05,
        'pos_embedding': jax.random.normal(keys[1], (max_length, hidden_dim),
                                           jnp.float32) * 0.05,
        'layers': [],
    }
    for li in range(n_layers):
        lk = jax.random.split(keys[2 + li], 16)
        lp = {
            'wq': jax.random.normal(lk[0], (hidden_dim, hidden_dim), jnp.float32) * 0.05,
            'bq': jax.random.normal(lk[1], (1, hidden_dim), jnp.float32) * 0.02,
            'wk': jax.random.normal(lk[2], (hidden_dim, hidden_dim), jnp.float32) * 0.05,
            'bk': jax.random.normal(lk[3], (1, hidden_dim), jnp.float32) * 0.02,
            'wv': jax.random.normal(lk[4], (hidden_dim, hidden_dim), jnp.float32) * 0.05,
            'bv': jax.random.normal(lk[5], (1, hidden_dim), jnp.float32) * 0.02,
            'wo': jax.random.normal(lk[6], (hidden_dim, hidden_dim), jnp.float32) * 0.05,
            'bo': jax.random.normal(lk[7], (1, hidden_dim), jnp.float32) * 0.02,
            'ln1_g': 1.0 + jax.random.normal(lk[8], (1, hidden_dim), jnp.float32) * 0.05,
            'ln1_b': jax.random.normal(lk[9], (1, hidden_dim), jnp.float32) * 0.02,
            'w1': jax.random.normal(lk[10], (hidden_dim, pf_dim), jnp.float32) * 0.05,
            'b1': jax.random.normal(lk[11], (1, pf_dim), jnp.float32) * 0.02,
            'w2': jax.random.normal(lk[12], (pf_dim, hidden_dim), jnp.float32) * 0.05,
            'b2': jax.random.normal(lk[13], (1, hidden_dim), jnp.float32) * 0.02,
            'ln2_g': 1.0 + jax.random.normal(lk[14], (1, hidden_dim), jnp.float32) * 0.05,
            'ln2_b': jax.random.normal(lk[15], (1, hidden_dim), jnp.float32) * 0.02,
        }
        params['layers'].append(lp)
    return params


# ------------------------- main -------------------------

if __name__ == "__main__":
    # Small config consistent with Encoder.__init__
    INPUT_DIM = 16     # vocab size
    HIDDEN = 32
    N_LAYERS = 2
    N_HEADS = 4
    PF_DIM = 64
    MAX_LEN = 16
    RETURN_CLS = True

    B, S = 2, 8

    key = jax.random.PRNGKey(0)
    k_param, k_tok = jax.random.split(key)
    params = init_params(k_param, input_dim=INPUT_DIM, hidden_dim=HIDDEN,
                         n_layers=N_LAYERS, pf_dim=PF_DIM, max_length=MAX_LEN)
    tokens = jax.random.randint(k_tok, (B, S), 0, INPUT_DIM, dtype=jnp.int32)

    cls_out, end_out = encoder_forward(tokens, params,
                                       n_heads=N_HEADS, return_cls=RETURN_CLS)
    jax.block_until_ready(cls_out)
    jax.block_until_ready(end_out)

    # Correctness check against a pure-JAX reference (same bf16 dot boundaries;
    # tolerance also covers the EUP approximate reciprocal in the softmax).
    cls_ref, end_ref = _ref_encoder(tokens, params, N_HEADS, RETURN_CLS)
    assert cls_out.shape == (B, 1, HIDDEN) and end_out.shape == (B, 1, HIDDEN)
    assert jnp.allclose(cls_out, cls_ref, atol=1e-2, rtol=1e-2)
    assert jnp.allclose(end_out, end_ref, atol=1e-2, rtol=1e-2)

    print("KERNEL_OK")
</pallas_src>

<mosaic_0001>
module attributes {stable_mosaic.version = 11 : i64} {
  func.func @encoder_stack_kernel(%arg0: i32, %arg1: i32, %arg2: memref<1x8x32xf32, #tpu.memory_space<vmem>>, %arg3: memref<1x32x96xbf16, #tpu.memory_space<vmem>>, %arg4: memref<1x1x96xf32, #tpu.memory_space<vmem>>, %arg5: memref<1x4x8x32xbf16, #tpu.memory_space<vmem>>, %arg6: memref<1x1x32xf32, #tpu.memory_space<vmem>>, %arg7: memref<1x1x32xf32, #tpu.memory_space<vmem>>, %arg8: memref<1x1x32xf32, #tpu.memory_space<vmem>>, %arg9: memref<1x32x64xbf16, #tpu.memory_space<vmem>>, %arg10: memref<1x1x64xf32, #tpu.memory_space<vmem>>, %arg11: memref<1x64x32xbf16, #tpu.memory_space<vmem>>, %arg12: memref<1x1x32xf32, #tpu.memory_space<vmem>>, %arg13: memref<1x1x32xf32, #tpu.memory_space<vmem>>, %arg14: memref<1x1x32xf32, #tpu.memory_space<vmem>>, %arg15: memref<1x8x32xf32, #tpu.memory_space<vmem>>, %arg16: memref<8x32xf32, #tpu.memory_space<vmem>>) attributes {dimension_semantics = [#tpu.dimension_semantics<parallel>, #tpu.dimension_semantics<arbitrary>], iteration_bounds = array<i64: 2, 2>, scalar_prefetch = 0 : i64, scratch_operands = 1 : i64, tpu.core_type = #tpu.core_type<tc>, window_params = [{transform_indices = @transform_0, window_bounds = array<i64: 1, 8, 32>}, {transform_indices = @transform_1, window_bounds = array<i64: 1, 32, 96>}, {transform_indices = @transform_2, window_bounds = array<i64: 1, 1, 96>}, {transform_indices = @transform_3, window_bounds = array<i64: 1, 4, 8, 32>}, {transform_indices = @transform_4, window_bounds = array<i64: 1, 1, 32>}, {transform_indices = @transform_5, window_bounds = array<i64: 1, 1, 32>}, {transform_indices = @transform_6, window_bounds = array<i64: 1, 1, 32>}, {transform_indices = @transform_7, window_bounds = array<i64: 1, 32, 64>}, {transform_indices = @transform_8, window_bounds = array<i64: 1, 1, 64>}, {transform_indices = @transform_9, window_bounds = array<i64: 1, 64, 32>}, {transform_indices = @transform_10, window_bounds = array<i64: 1, 1, 32>}, {transform_indices = @transform_11, window_bounds = array<i64: 1, 1, 32>}, {transform_indices = @transform_12, window_bounds = array<i64: 1, 1, 32>}, {transform_indices = @transform_13, window_bounds = array<i64: 1, 8, 32>}]} {
    %c0_i32 = arith.constant 0 : i32
    %0 = arith.cmpi eq, %arg1, %c0_i32 : i32
    %1 = arith.extui %0 : i1 to i32
    %c0_i32_0 = arith.constant 0 : i32
    %2 = arith.cmpi ne, %1, %c0_i32_0 : i32
    scf.if %2 {
      %c0_79 = arith.constant 0 : index
      %c0_80 = arith.constant 0 : index
      %c0_81 = arith.constant 0 : index
      %197 = vector.load %arg2[%c0_79, %c0_80, %c0_81] : memref<1x8x32xf32, #tpu.memory_space<vmem>>, vector<1x8x32xf32>
      %198 = vector.shape_cast %197 : vector<1x8x32xf32> to vector<8x32xf32>
      %c0_82 = arith.constant 0 : index
      %c0_83 = arith.constant 0 : index
      %199 = vector.load %arg16[%c0_82, %c0_83] : memref<8x32xf32, #tpu.memory_space<vmem>>, vector<8x32xf32>
      tpu.vector_store %arg16[%c0_82, %c0_83], %198 {strides = array<i32>} : memref<8x32xf32, #tpu.memory_space<vmem>>, vector<8x32xf32>,
    } else {
    }
    %c0 = arith.constant 0 : index
    %c0_1 = arith.constant 0 : index
    %3 = vector.load %arg16[%c0, %c0_1] : memref<8x32xf32, #tpu.memory_space<vmem>>, vector<8x32xf32>
    %4 = arith.truncf %3 : vector<8x32xf32> to vector<8x32xbf16>
    %c0_2 = arith.constant 0 : index
    %c0_3 = arith.constant 0 : index
    %c0_4 = arith.constant 0 : index
    %5 = vector.load %arg3[%c0_2, %c0_3, %c0_4] : memref<1x32x96xbf16, #tpu.memory_space<vmem>>, vector<1x32x96xbf16>
    %6 = vector.shape_cast %5 : vector<1x32x96xbf16> to vector<32x96xbf16>
    %cst = arith.constant dense<0.000000e+00> : vector<8x96xf32>
    %7 = tpu.matmul %4, %6, %cst {dimension_numbers = #tpu.dot_dimension_numbers<[1], [0], [0], [1], [0, 0, 1, 1], [], []>} : vector<8x32xbf16>, vector<32x96xbf16>, vector<8x96xf32> -> vector<8x96xf32>
    %c0_5 = arith.constant 0 : index
    %c0_6 = arith.constant 0 : index
    %c0_7 = arith.constant 0 : index
    %8 = vector.load %arg4[%c0_5, %c0_6, %c0_7] : memref<1x1x96xf32, #tpu.memory_space<vmem>>, vector<1x1x96xf32>
    %9 = vector.shape_cast %8 : vector<1x1x96xf32> to vector<1x96xf32>
    %10 = vector.broadcast %9 : vector<1x96xf32> to vector<8x96xf32>
    %11 = arith.addf %7, %10 : vector<8x96xf32>
    %c0_8 = arith.constant 0 : index
    %c0_9 = arith.constant 0 : index
    %c0_10 = arith.constant 0 : index
    %c0_11 = arith.constant 0 : index
    %12 = vector.load %arg5[%c0_8, %c0_9, %c0_10, %c0_11] : memref<1x4x8x32xbf16, #tpu.memory_space<vmem>>, vector<1x4x8x32xbf16>
    %13 = vector.shape_cast %12 : vector<1x4x8x32xbf16> to vector<4x8x32xbf16>
    %14 = vector.extract_strided_slice %11 {offsets = [0, 0], sizes = [8, 8], strides = [1, 1]} : vector<8x96xf32> to vector<8x8xf32>
    %15 = arith.truncf %14 : vector<8x8xf32> to vector<8x8xbf16>
    %16 = vector.extract_strided_slice %11 {offsets = [0, 32], sizes = [8, 8], strides = [1, 1]} : vector<8x96xf32> to vector<8x8xf32>
    %17 = arith.truncf %16 : vector<8x8xf32> to vector<8x8xbf16>
    %18 = vector.extract_strided_slice %11 {offsets = [0, 64], sizes = [8, 8], strides = [1, 1]} : vector<8x96xf32> to vector<8x8xf32>
    %19 = arith.truncf %18 : vector<8x8xf32> to vector<8x8xbf16>
    %cst_12 = arith.constant dense<0.000000e+00> : vector<8x8xf32>
    %20 = tpu.matmul %15, %17, %cst_12 {dimension_numbers = #tpu.dot_dimension_numbers<[1], [1], [0], [0], [0, 0, 1, 0], [], []>} : vector<8x8xbf16>, vector<8x8xbf16>, vector<8x8xf32> -> vector<8x8xf32>
    %cst_13 = arith.constant 0.353553385 : f32
    %21 = vector.broadcast %cst_13 : f32 to vector<8x8xf32>
    %22 = arith.mulf %20, %21 : vector<8x8xf32>
    %cst_14 = arith.constant dense<0xFF800000> : vector<8xf32>
    %23 = vector.multi_reduction <maximumf>, %22, %cst_14 [1] : vector<8x8xf32> to vector<8xf32>
    %24 = vector.shape_cast %23 : vector<8xf32> to vector<8x1xf32>
    %25 = vector.broadcast %24 : vector<8x1xf32> to vector<8x8xf32>
    %26 = arith.subf %22, %25 : vector<8x8xf32>
    %27 = math.exp %26 : vector<8x8xf32>
    %cst_15 = arith.constant dense<0.000000e+00> : vector<8xf32>
    %28 = vector.multi_reduction <add>, %27, %cst_15 [1] : vector<8x8xf32> to vector<8xf32>
    %29 = vector.shape_cast %28 : vector<8xf32> to vector<8x1xf32>
    %30 = tpu.reciprocal %29 {approx = true} : vector<8x1xf32> -> vector<8x1xf32>
    %31 = vector.broadcast %30 : vector<8x1xf32> to vector<8x8xf32>
    %32 = arith.mulf %27, %31 : vector<8x8xf32>
    %33 = arith.truncf %32 : vector<8x8xf32> to vector<8x8xbf16>
    %cst_16 = arith.constant dense<0.000000e+00> : vector<8x8xf32>
    %34 = tpu.matmul %33, %19, %cst_16 {dimension_numbers = #tpu.dot_dimension_numbers<[1], [0], [0], [1], [0, 0, 1, 1], [], []>} : vector<8x8xbf16>, vector<8x8xbf16>, vector<8x8xf32> -> vector<8x8xf32>
    %35 = arith.truncf %34 : vector<8x8xf32> to vector<8x8xbf16>
    %36 = vector.extract_strided_slice %13 {offsets = [0, 0, 0], sizes = [1, 8, 32], strides = [1, 1, 1]} : vector<4x8x32xbf16> to vector<1x8x32xbf16>
    %37 = vector.shape_cast %36 : vector<1x8x32xbf16> to vector<8x32xbf16>
    %cst_17 = arith.constant dense<0.000000e+00> : vector<8x32xf32>
    %38 = tpu.matmul %35, %37, %cst_17 {dimension_numbers = #tpu.dot_dimension_numbers<[1], [0], [0], [1], [0, 0, 1, 1], [], []>} : vector<8x8xbf16>, vector<8x32xbf16>, vector<8x32xf32> -> vector<8x32xf32>
    %39 = vector.extract_strided_slice %11 {offsets = [0, 8], sizes = [8, 8], strides = [1, 1]} : vector<8x96xf32> to vector<8x8xf32>
    %40 = arith.truncf %39 : vector<8x8xf32> to vector<8x8xbf16>
    %41 = vector.extract_strided_slice %11 {offsets = [0, 40], sizes = [8, 8], strides = [1, 1]} : vector<8x96xf32> to vector<8x8xf32>
    %42 = arith.truncf %41 : vector<8x8xf32> to vector<8x8xbf16>
    %43 = vector.extract_strided_slice %11 {offsets = [0, 72], sizes = [8, 8], strides = [1, 1]} : vector<8x96xf32> to vector<8x8xf32>
    %44 = arith.truncf %43 : vector<8x8xf32> to vector<8x8xbf16>
    %cst_18 = arith.constant dense<0.000000e+00> : vector<8x8xf32>
    %45 = tpu.matmul %40, %42, %cst_18 {dimension_numbers = #tpu.dot_dimension_numbers<[1], [1], [0], [0], [0, 0, 1, 0], [], []>} : vector<8x8xbf16>, vector<8x8xbf16>, vector<8x8xf32> -> vector<8x8xf32>
    %cst_19 = arith.constant 0.353553385 : f32
    %46 = vector.broadcast %cst_19 : f32 to vector<8x8xf32>
    %47 = arith.mulf %45, %46 : vector<8x8xf32>
    %cst_20 = arith.constant dense<0xFF800000> : vector<8xf32>
    %48 = vector.multi_reduction <maximumf>, %47, %cst_20 [1] : vector<8x8xf32> to vector<8xf32>
    %49 = vector.shape_cast %48 : vector<8xf32> to vector<8x1xf32>
    %50 = vector.broadcast %49 : vector<8x1xf32> to vector<8x8xf32>
    %51 = arith.subf %47, %50 : vector<8x8xf32>
    %52 = math.exp %51 : vector<8x8xf32>
    %cst_21 = arith.constant dense<0.000000e+00> : vector<8xf32>
    %53 = vector.multi_reduction <add>, %52, %cst_21 [1] : vector<8x8xf32> to vector<8xf32>
    %54 = vector.shape_cast %53 : vector<8xf32> to vector<8x1xf32>
    %55 = tpu.reciprocal %54 {approx = true} : vector<8x1xf32> -> vector<8x1xf32>
    %56 = vector.broadcast %55 : vector<8x1xf32> to vector<8x8xf32>
    %57 = arith.mulf %52, %56 : vector<8x8xf32>
    %58 = arith.truncf %57 : vector<8x8xf32> to vector<8x8xbf16>
    %cst_22 = arith.constant dense<0.000000e+00> : vector<8x8xf32>
    %59 = tpu.matmul %58, %44, %cst_22 {dimension_numbers = #tpu.dot_dimension_numbers<[1], [0], [0], [1], [0, 0, 1, 1], [], []>} : vector<8x8xbf16>, vector<8x8xbf16>, vector<8x8xf32> -> vector<8x8xf32>
    %60 = arith.truncf %59 : vector<8x8xf32> to vector<8x8xbf16>
    %61 = vector.extract_strided_slice %13 {offsets = [1, 0, 0], sizes = [1, 8, 32], strides = [1, 1, 1]} : vector<4x8x32xbf16> to vector<1x8x32xbf16>
    %62 = vector.shape_cast %61 : vector<1x8x32xbf16> to vector<8x32xbf16>
    %cst_23 = arith.constant dense<0.000000e+00> : vector<8x32xf32>
    %63 = tpu.matmul %60, %62, %cst_23 {dimension_numbers = #tpu.dot_dimension_numbers<[1], [0], [0], [1], [0, 0, 1, 1], [], []>} : vector<8x8xbf16>, vector<8x32xbf16>, vector<8x32xf32> -> vector<8x32xf32>
    %64 = arith.addf %38, %63 : vector<8x32xf32>
    %65 = vector.extract_strided_slice %11 {offsets = [0, 16], sizes = [8, 8], strides = [1, 1]} : vector<8x96xf32> to vector<8x8xf32>
    %66 = arith.truncf %65 : vector<8x8xf32> to vector<8x8xbf16>
    %67 = vector.extract_strided_slice %11 {offsets = [0, 48], sizes = [8, 8], strides = [1, 1]} : vector<8x96xf32> to vector<8x8xf32>
    %68 = arith.truncf %67 : vector<8x8xf32> to vector<8x8xbf16>
    %69 = vector.extract_strided_slice %11 {offsets = [0, 80], sizes = [8, 8], strides = [1, 1]} : vector<8x96xf32> to vector<8x8xf32>
    %70 = arith.truncf %69 : vector<8x8xf32> to vector<8x8xbf16>
    %cst_24 = arith.constant dense<0.000000e+00> : vector<8x8xf32>
    %71 = tpu.matmul %66, %68, %cst_24 {dimension_numbers = #tpu.dot_dimension_numbers<[1], [1], [0], [0], [0, 0, 1, 0], [], []>} : vector<8x8xbf16>, vector<8x8xbf16>, vector<8x8xf32> -> vector<8x8xf32>
    %cst_25 = arith.constant 0.353553385 : f32
    %72 = vector.broadcast %cst_25 : f32 to vector<8x8xf32>
    %73 = arith.mulf %71, %72 : vector<8x8xf32>
    %cst_26 = arith.constant dense<0xFF800000> : vector<8xf32>
    %74 = vector.multi_reduction <maximumf>, %73, %cst_26 [1] : vector<8x8xf32> to vector<8xf32>
    %75 = vector.shape_cast %74 : vector<8xf32> to vector<8x1xf32>
    %76 = vector.broadcast %75 : vector<8x1xf32> to vector<8x8xf32>
    %77 = arith.subf %73, %76 : vector<8x8xf32>
    %78 = math.exp %77 : vector<8x8xf32>
    %cst_27 = arith.constant dense<0.000000e+00> : vector<8xf32>
    %79 = vector.multi_reduction <add>, %78, %cst_27 [1] : vector<8x8xf32> to vector<8xf32>
    %80 = vector.shape_cast %79 : vector<8xf32> to vector<8x1xf32>
    %81 = tpu.reciprocal %80 {approx = true} : vector<8x1xf32> -> vector<8x1xf32>
    %82 = vector.broadcast %81 : vector<8x1xf32> to vector<8x8xf32>
    %83 = arith.mulf %78, %82 : vector<8x8xf32>
    %84 = arith.truncf %83 : vector<8x8xf32> to vector<8x8xbf16>
    %cst_28 = arith.constant dense<0.000000e+00> : vector<8x8xf32>
    %85 = tpu.matmul %84, %70, %cst_28 {dimension_numbers = #tpu.dot_dimension_numbers<[1], [0], [0], [1], [0, 0, 1, 1], [], []>} : vector<8x8xbf16>, vector<8x8xbf16>, vector<8x8xf32> -> vector<8x8xf32>
    %86 = arith.truncf %85 : vector<8x8xf32> to vector<8x8xbf16>
    %87 = vector.extract_strided_slice %13 {offsets = [2, 0, 0], sizes = [1, 8, 32], strides = [1, 1, 1]} : vector<4x8x32xbf16> to vector<1x8x32xbf16>
    %88 = vector.shape_cast %87 : vector<1x8x32xbf16> to vector<8x32xbf16>
    %cst_29 = arith.constant dense<0.000000e+00> : vector<8x32xf32>
    %89 = tpu.matmul %86, %88, %cst_29 {dimension_numbers = #tpu.dot_dimension_numbers<[1], [0], [0], [1], [0, 0, 1, 1], [], []>} : vector<8x8xbf16>, vector<8x32xbf16>, vector<8x32xf32> -> vector<8x32xf32>
    %90 = arith.addf %64, %89 : vector<8x32xf32>
    %91 = vector.extract_strided_slice %11 {offsets = [0, 24], sizes = [8, 8], strides = [1, 1]} : vector<8x96xf32> to vector<8x8xf32>
    %92 = arith.truncf %91 : vector<8x8xf32> to vector<8x8xbf16>
    %93 = vector.extract_strided_slice %11 {offsets = [0, 56], sizes = [8, 8], strides = [1, 1]} : vector<8x96xf32> to vector<8x8xf32>
    %94 = arith.truncf %93 : vector<8x8xf32> to vector<8x8xbf16>
    %95 = vector.extract_strided_slice %11 {offsets = [0, 88], sizes = [8, 8], strides = [1, 1]} : vector<8x96xf32> to vector<8x8xf32>
    %96 = arith.truncf %95 : vector<8x8xf32> to vector<8x8xbf16>
    %cst_30 = arith.constant dense<0.000000e+00> : vector<8x8xf32>
    %97 = tpu.matmul %92, %94, %cst_30 {dimension_numbers = #tpu.dot_dimension_numbers<[1], [1], [0], [0], [0, 0, 1, 0], [], []>} : vector<8x8xbf16>, vector<8x8xbf16>, vector<8x8xf32> -> vector<8x8xf32>
    %cst_31 = arith.constant 0.353553385 : f32
    %98 = vector.broadcast %cst_31 : f32 to vector<8x8xf32>
    %99 = arith.mulf %97, %98 : vector<8x8xf32>
    %cst_32 = arith.constant dense<0xFF800000> : vector<8xf32>
    %100 = vector.multi_reduction <maximumf>, %99, %cst_32 [1] : vector<8x8xf32> to vector<8xf32>
    %101 = vector.shape_cast %100 : vector<8xf32> to vector<8x1xf32>
    %102 = vector.broadcast %101 : vector<8x1xf32> to vector<8x8xf32>
    %103 = arith.subf %99, %102 : vector<8x8xf32>
    %104 = math.exp %103 : vector<8x8xf32>
    %cst_33 = arith.constant dense<0.000000e+00> : vector<8xf32>
    %105 = vector.multi_reduction <add>, %104, %cst_33 [1] : vector<8x8xf32> to vector<8xf32>
    %106 = vector.shape_cast %105 : vector<8xf32> to vector<8x1xf32>
    %107 = tpu.reciprocal %106 {approx = true} : vector<8x1xf32> -> vector<8x1xf32>
    %108 = vector.broadcast %107 : vector<8x1xf32> to vector<8x8xf32>
    %109 = arith.mulf %104, %108 : vector<8x8xf32>
    %110 = arith.truncf %109 : vector<8x8xf32> to vector<8x8xbf16>
    %cst_34 = arith.constant dense<0.000000e+00> : vector<8x8xf32>
    %111 = tpu.matmul %110, %96, %cst_34 {dimension_numbers = #tpu.dot_dimension_numbers<[1], [0], [0], [1], [0, 0, 1, 1], [], []>} : vector<8x8xbf16>, vector<8x8xbf16>, vector<8x8xf32> -> vector<8x8xf32>
    %112 = arith.truncf %111 : vector<8x8xf32> to vector<8x8xbf16>
    %113 = vector.extract_strided_slice %13 {offsets = [3, 0, 0], sizes = [1, 8, 32], strides = [1, 1, 1]} : vector<4x8x32xbf16> to vector<1x8x32xbf16>
    %114 = vector.shape_cast %113 : vector<1x8x32xbf16> to vector<8x32xbf16>
    %cst_35 = arith.constant dense<0.000000e+00> : vector<8x32xf32>
    %115 = tpu.matmul %112, %114, %cst_35 {dimension_numbers = #tpu.dot_dimension_numbers<[1], [0], [0], [1], [0, 0, 1, 1], [], []>} : vector<8x8xbf16>, vector<8x32xbf16>, vector<8x32xf32> -> vector<8x32xf32>
    %116 = arith.addf %90, %115 : vector<8x32xf32>
    %c0_36 = arith.constant 0 : index
    %c0_37 = arith.constant 0 : index
    %c0_38 = arith.constant 0 : index
    %117 = vector.load %arg6[%c0_36, %c0_37, %c0_38] : memref<1x1x32xf32, #tpu.memory_space<vmem>>, vector<1x1x32xf32>
    %118 = vector.shape_cast %117 : vector<1x1x32xf32> to vector<1x32xf32>
    %119 = vector.broadcast %118 : vector<1x32xf32> to vector<8x32xf32>
    %120 = arith.addf %116, %119 : vector<8x32xf32>
    %121 = arith.addf %3, %120 : vector<8x32xf32>
    %cst_39 = arith.constant dense<0.000000e+00> : vector<8xf32>
    %122 = vector.multi_reduction <add>, %121, %cst_39 [1] : vector<8x32xf32> to vector<8xf32>
    %123 = vector.shape_cast %122 : vector<8xf32> to vector<8x1xf32>
    %cst_40 = arith.constant 3.200000e+01 : f32
    %124 = vector.broadcast %cst_40 : f32 to vector<8x1xf32>
    %125 = arith.divf %123, %124 : vector<8x1xf32>
    %126 = vector.broadcast %125 : vector<8x1xf32> to vector<8x32xf32>
    %127 = arith.subf %121, %126 : vector<8x32xf32>
    %128 = arith.mulf %127, %127 : vector<8x32xf32>
    %cst_41 = arith.constant dense<0.000000e+00> : vector<8xf32>
    %129 = vector.multi_reduction <add>, %128, %cst_41 [1] : vector<8x32xf32> to vector<8xf32>
    %130 = vector.shape_cast %129 : vector<8xf32> to vector<8x1xf32>
    %cst_42 = arith.constant 3.200000e+01 : f32
    %131 = vector.broadcast %cst_42 : f32 to vector<8x1xf32>
    %132 = arith.divf %130, %131 : vector<8x1xf32>
    %133 = vector.broadcast %125 : vector<8x1xf32> to vector<8x32xf32>
    %134 = arith.subf %121, %133 : vector<8x32xf32>
    %cst_43 = arith.constant 9.99999974E-6 : f32
    %135 = vector.broadcast %cst_43 : f32 to vector<8x1xf32>
    %136 = arith.addf %132, %135 : vector<8x1xf32>
    %137 = math.rsqrt %136 : vector<8x1xf32>
    %138 = vector.broadcast %137 : vector<8x1xf32> to vector<8x32xf32>
    %139 = arith.mulf %134, %138 : vector<8x32xf32>
    %c0_44 = arith.constant 0 : index
    %c0_45 = arith.constant 0 : index
    %c0_46 = arith.constant 0 : index
    %140 = vector.load %arg7[%c0_44, %c0_45, %c0_46] : memref<1x1x32xf32, #tpu.memory_space<vmem>>, vector<1x1x32xf32>
    %141 = vector.shape_cast %140 : vector<1x1x32xf32> to vector<1x32xf32>
    %142 = vector.broadcast %141 : vector<1x32xf32> to vector<8x32xf32>
    %143 = arith.mulf %139, %142 : vector<8x32xf32>
    %c0_47 = arith.constant 0 : index
    %c0_48 = arith.constant 0 : index
    %c0_49 = arith.constant 0 : index
    %144 = vector.load %arg8[%c0_47, %c0_48, %c0_49] : memref<1x1x32xf32, #tpu.memory_space<vmem>>, vector<1x1x32xf32>
    %145 = vector.shape_cast %144 : vector<1x1x32xf32> to vector<1x32xf32>
    %146 = vector.broadcast %145 : vector<1x32xf32> to vector<8x32xf32>
    %147 = arith.addf %143, %146 : vector<8x32xf32>
    %148 = arith.truncf %147 : vector<8x32xf32> to vector<8x32xbf16>
    %c0_50 = arith.constant 0 : index
    %c0_51 = arith.constant 0 : index
    %c0_52 = arith.constant 0 : index
    %149 = vector.load %arg9[%c0_50, %c0_51, %c0_52] : memref<1x32x64xbf16, #tpu.memory_space<vmem>>, vector<1x32x64xbf16>
    %150 = vector.shape_cast %149 : vector<1x32x64xbf16> to vector<32x64xbf16>
    %cst_53 = arith.constant dense<0.000000e+00> : vector<8x64xf32>
    %151 = tpu.matmul %148, %150, %cst_53 {dimension_numbers = #tpu.dot_dimension_numbers<[1], [0], [0], [1], [0, 0, 1, 1], [], []>} : vector<8x32xbf16>, vector<32x64xbf16>, vector<8x64xf32> -> vector<8x64xf32>
    %c0_54 = arith.constant 0 : index
    %c0_55 = arith.constant 0 : index
    %c0_56 = arith.constant 0 : index
    %152 = vector.load %arg10[%c0_54, %c0_55, %c0_56] : memref<1x1x64xf32, #tpu.memory_space<vmem>>, vector<1x1x64xf32>
    %153 = vector.shape_cast %152 : vector<1x1x64xf32> to vector<1x64xf32>
    %154 = vector.broadcast %153 : vector<1x64xf32> to vector<8x64xf32>
    %155 = arith.addf %151, %154 : vector<8x64xf32>
    %cst_57 = arith.constant 0.000000e+00 : f32
    %156 = vector.broadcast %cst_57 : f32 to vector<8x64xf32>
    %157 = arith.maximumf %155, %156 : vector<8x64xf32>
    %158 = arith.truncf %157 : vector<8x64xf32> to vector<8x64xbf16>
    %c0_58 = arith.constant 0 : index
    %c0_59 = arith.constant 0 : index
    %c0_60 = arith.constant 0 : index
    %159 = vector.load %arg11[%c0_58, %c0_59, %c0_60] : memref<1x64x32xbf16, #tpu.memory_space<vmem>>, vector<1x64x32xbf16>
    %160 = vector.shape_cast %159 : vector<1x64x32xbf16> to vector<64x32xbf16>
    %cst_61 = arith.constant dense<0.000000e+00> : vector<8x32xf32>
    %161 = tpu.matmul %158, %160, %cst_61 {dimension_numbers = #tpu.dot_dimension_numbers<[1], [0], [0], [1], [0, 0, 1, 1], [], []>} : vector<8x64xbf16>, vector<64x32xbf16>, vector<8x32xf32> -> vector<8x32xf32>
    %c0_62 = arith.constant 0 : index
    %c0_63 = arith.constant 0 : index
    %c0_64 = arith.constant 0 : index
    %162 = vector.load %arg12[%c0_62, %c0_63, %c0_64] : memref<1x1x32xf32, #tpu.memory_space<vmem>>, vector<1x1x32xf32>
    %163 = vector.shape_cast %162 : vector<1x1x32xf32> to vector<1x32xf32>
    %164 = vector.broadcast %163 : vector<1x32xf32> to vector<8x32xf32>
    %165 = arith.addf %161, %164 : vector<8x32xf32>
    %166 = arith.addf %147, %165 : vector<8x32xf32>
    %cst_65 = arith.constant dense<0.000000e+00> : vector<8xf32>
    %167 = vector.multi_reduction <add>, %166, %cst_65 [1] : vector<8x32xf32> to vector<8xf32>
    %168 = vector.shape_cast %167 : vector<8xf32> to vector<8x1xf32>
    %cst_66 = arith.constant 3.200000e+01 : f32
    %169 = vector.broadcast %cst_66 : f32 to vector<8x1xf32>
    %170 = arith.divf %168, %169 : vector<8x1xf32>
    %171 = vector.broadcast %170 : vector<8x1xf32> to vector<8x32xf32>
    %172 = arith.subf %166, %171 : vector<8x32xf32>
    %173 = arith.mulf %172, %172 : vector<8x32xf32>
    %cst_67 = arith.constant dense<0.000000e+00> : vector<8xf32>
    %174 = vector.multi_reduction <add>, %173, %cst_67 [1] : vector<8x32xf32> to vector<8xf32>
    %175 = vector.shape_cast %174 : vector<8xf32> to vector<8x1xf32>
    %cst_68 = arith.constant 3.200000e+01 : f32
    %176 = vector.broadcast %cst_68 : f32 to vector<8x1xf32>
    %177 = arith.divf %175, %176 : vector<8x1xf32>
    %178 = vector.broadcast %170 : vector<8x1xf32> to vector<8x32xf32>
    %179 = arith.subf %166, %178 : vector<8x32xf32>
    %cst_69 = arith.constant 9.99999974E-6 : f32
    %180 = vector.broadcast %cst_69 : f32 to vector<8x1xf32>
    %181 = arith.addf %177, %180 : vector<8x1xf32>
    %182 = math.rsqrt %181 : vector<8x1xf32>
    %183 = vector.broadcast %182 : vector<8x1xf32> to vector<8x32xf32>
    %184 = arith.mulf %179, %183 : vector<8x32xf32>
    %c0_70 = arith.constant 0 : index
    %c0_71 = arith.constant 0 : index
    %c0_72 = arith.constant 0 : index
    %185 = vector.load %arg13[%c0_70, %c0_71, %c0_72] : memref<1x1x32xf32, #tpu.memory_space<vmem>>, vector<1x1x32xf32>
    %186 = vector.shape_cast %185 : vector<1x1x32xf32> to vector<1x32xf32>
    %187 = vector.broadcast %186 : vector<1x32xf32> to vector<8x32xf32>
    %188 = arith.mulf %184, %187 : vector<8x32xf32>
    %c0_73 = arith.constant 0 : index
    %c0_74 = arith.constant 0 : index
    %c0_75 = arith.constant 0 : index
    %189 = vector.load %arg14[%c0_73, %c0_74, %c0_75] : memref<1x1x32xf32, #tpu.memory_space<vmem>>, vector<1x1x32xf32>
    %190 = vector.shape_cast %189 : vector<1x1x32xf32> to vector<1x32xf32>
    %191 = vector.broadcast %190 : vector<1x32xf32> to vector<8x32xf32>
    %192 = arith.addf %188, %191 : vector<8x32xf32>
    %c0_76 = arith.constant 0 : index
    %c0_77 = arith.constant 0 : index
    %193 = vector.load %arg16[%c0_76, %c0_77] : memref<8x32xf32, #tpu.memory_space<vmem>>, vector<8x32xf32>
    tpu.vector_store %arg16[%c0_76, %c0_77], %192 {strides = array<i32>} : memref<8x32xf32, #tpu.memory_space<vmem>>, vector<8x32xf32>,
    %c1_i32 = arith.constant 1 : i32
    %194 = arith.cmpi eq, %arg1, %c1_i32 : i32
    %195 = arith.extui %194 : i1 to i32
    %c0_i32_78 = arith.constant 0 : i32
    %196 = arith.cmpi ne, %195, %c0_i32_78 : i32
    scf.if %196 {
      %c0_79 = arith.constant 0 : index
      %c0_80 = arith.constant 0 : index
      %c0_81 = arith.constant 0 : index
      %197 = vector.load %arg15[%c0_79, %c0_80, %c0_81] : memref<1x8x32xf32, #tpu.memory_space<vmem>>, vector<1x8x32xf32>
      %198 = vector.shape_cast %197 : vector<1x8x32xf32> to vector<8x32xf32>
      %199 = vector.shape_cast %192 : vector<8x32xf32> to vector<1x8x32xf32>
      tpu.vector_store %arg15[%c0_79, %c0_80, %c0_81], %199 {strides = array<i32>} : memref<1x8x32xf32, #tpu.memory_space<vmem>>, vector<1x8x32xf32>,
    } else {
    }
    return
  }
  func.func @transform_0(%arg0: i32, %arg1: i32) -> (i32, i32, i32) {
    %c0_i32 = arith.constant 0 : i32
    %c0_i32_0 = arith.constant 0 : i32
    %c0_i32_1 = arith.constant 0 : i32
    return %arg0, %c0_i32, %c0_i32_0 : i32, i32, i32
  }
  func.func @transform_1(%arg0: i32, %arg1: i32) -> (i32, i32, i32) {
    %c0_i32 = arith.constant 0 : i32
    %c0_i32_0 = arith.constant 0 : i32
    %c0_i32_1 = arith.constant 0 : i32
    return %arg1, %c0_i32, %c0_i32_0 : i32, i32, i32
  }
  func.func @transform_2(%arg0: i32, %arg1: i32) -> (i32, i32, i32) {
    %c0_i32 = arith.constant 0 : i32
    %c0_i32_0 = arith.constant 0 : i32
    %c0_i32_1 = arith.constant 0 : i32
    return %arg1, %c0_i32, %c0_i32_0 : i32, i32, i32
  }
  func.func @transform_3(%arg0: i32, %arg1: i32) -> (i32, i32, i32, i32) {
    %c0_i32 = arith.constant 0 : i32
    %c0_i32_0 = arith.constant 0 : i32
    %c0_i32_1 = arith.constant 0 : i32
    %c0_i32_2 = arith.constant 0 : i32
    return %arg1, %c0_i32, %c0_i32_0, %c0_i32_1 : i32, i32, i32, i32
  }
  func.func @transform_4(%arg0: i32, %arg1: i32) -> (i32, i32, i32) {
    %c0_i32 = arith.constant 0 : i32
    %c0_i32_0 = arith.constant 0 : i32
    %c0_i32_1 = arith.constant 0 : i32
    return %arg1, %c0_i32, %c0_i32_0 : i32, i32, i32
  }
  func.func @transform_5(%arg0: i32, %arg1: i32) -> (i32, i32, i32) {
    %c0_i32 = arith.constant 0 : i32
    %c0_i32_0 = arith.constant 0 : i32
    %c0_i32_1 = arith.constant 0 : i32
    return %arg1, %c0_i32, %c0_i32_0 : i32, i32, i32
  }
  func.func @transform_6(%arg0: i32, %arg1: i32) -> (i32, i32, i32) {
    %c0_i32 = arith.constant 0 : i32
    %c0_i32_0 = arith.constant 0 : i32
    %c0_i32_1 = arith.constant 0 : i32
    return %arg1, %c0_i32, %c0_i32_0 : i32, i32, i32
  }
  func.func @transform_7(%arg0: i32, %arg1: i32) -> (i32, i32, i32) {
    %c0_i32 = arith.constant 0 : i32
    %c0_i32_0 = arith.constant 0 : i32
    %c0_i32_1 = arith.constant 0 : i32
    return %arg1, %c0_i32, %c0_i32_0 : i32, i32, i32
  }
  func.func @transform_8(%arg0: i32, %arg1: i32) -> (i32, i32, i32) {
    %c0_i32 = arith.constant 0 : i32
    %c0_i32_0 = arith.constant 0 : i32
    %c0_i32_1 = arith.constant 0 : i32
    return %arg1, %c0_i32, %c0_i32_0 : i32, i32, i32
  }
  func.func @transform_9(%arg0: i32, %arg1: i32) -> (i32, i32, i32) {
    %c0_i32 = arith.constant 0 : i32
    %c0_i32_0 = arith.constant 0 : i32
    %c0_i32_1 = arith.constant 0 : i32
    return %arg1, %c0_i32, %c0_i32_0 : i32, i32, i32
  }
  func.func @transform_10(%arg0: i32, %arg1: i32) -> (i32, i32, i32) {
    %c0_i32 = arith.constant 0 : i32
    %c0_i32_0 = arith.constant 0 : i32
    %c0_i32_1 = arith.constant 0 : i32
    return %arg1, %c0_i32, %c0_i32_0 : i32, i32, i32
  }
  func.func @transform_11(%arg0: i32, %arg1: i32) -> (i32, i32, i32) {
    %c0_i32 = arith.constant 0 : i32
    %c0_i32_0 = arith.constant 0 : i32
    %c0_i32_1 = arith.constant 0 : i32
    return %arg1, %c0_i32, %c0_i32_0 : i32, i32, i32
  }
  func.func @transform_12(%arg0: i32, %arg1: i32) -> (i32, i32, i32) {
    %c0_i32 = arith.constant 0 : i32
    %c0_i32_0 = arith.constant 0 : i32
    %c0_i32_1 = arith.constant 0 : i32
    return %arg1, %c0_i32, %c0_i32_0 : i32, i32, i32
  }
  func.func @transform_13(%arg0: i32, %arg1: i32) -> (i32, i32, i32) {
    %c0_i32 = arith.constant 0 : i32
    %c0_i32_0 = arith.constant 0 : i32
    %c0_i32_1 = arith.constant 0 : i32
    return %arg0, %c0_i32, %c0_i32_0 : i32, i32, i32
  }
}

</mosaic_0001>

<bundles_post_ra>
// kernel: tpu_custom_call.1
= control target key start
LH: loop header
LB: loop body
LE: loop exit
PB: predicated region body
PF: predicated region fallthrough
CT: control target
= control target key end

     0   :  { %s3262_s0 = inlined_call_operand.hbm [shape: f32[2,8,32], index: 0, kind: input, shape index: {}]   ;;  %s3263_s1 = inlined_call_operand.vmem [shape: bf16[2,32,96], index: 1, kind: input, shape index: {}]   ;;  %s3264_s2 = inlined_call_operand.vmem [shape: f32[2,1,96], index: 2, kind: input, shape index: {}]   ;;  %s3265_s3 = inlined_call_operand.vmem [shape: bf16[2,4,8,32], index: 3, kind: input, shape index: {}]   ;;  %s3266_s4 = inlined_call_operand.hbm [shape: f32[2,1,32], index: 4, kind: input, shape index: {}]   ;;  %s3267_s5 = inlined_call_operand.hbm [shape: f32[2,1,32], index: 5, kind: input, shape index: {}]   ;;  %s3268_s6 = inlined_call_operand.hbm [shape: f32[2,1,32], index: 6, kind: input, shape index: {}]   ;;  %s3269_s7 = inlined_call_operand.vmem [shape: bf16[2,32,64], index: 7, kind: input, shape index: {}]   ;;  %s3270_s8 = inlined_call_operand.hbm [shape: f32[2,1,64], index: 8, kind: input, shape index: {}]   ;;  %s3271_s9 = inlined_call_operand.vmem [shape: bf16[2,64,32], index: 9, kind: input, shape index: {}]   ;;  %s3272_s10 = inlined_call_operand.vmem [shape: f32[2,1,32], index: 10, kind: input, shape index: {}]   ;;  %s3273_s11 = inlined_call_operand.vmem [shape: f32[2,1,32], index: 11, kind: input, shape index: {}]   ;;  %s3274_s12 = inlined_call_operand.vmem [shape: f32[2,1,32], index: 12, kind: input, shape index: {}]   ;;  %s3275_s13 = inlined_call_operand.hbm [shape: f32[2,8,32], index: 13, kind: output, shape index: {}]  }
   0x1   :  { %3299 = sst [smem:[#allocation32_spill]] %s3262_s0 }
   0x2   :  { %3300 = sst [smem:[#allocation33_spill]] %s3263_s1 }
   0x3   :  { %3301 = sst [smem:[#allocation34_spill]] %s3264_s2 }
   0x4   :  { %3302 = sst [smem:[#allocation35_spill]] %s3265_s3 }
   0x5   :  { %3303 = sst [smem:[#allocation36_spill]] %s3266_s4 }
   0x6   :  { %3304 = sst [smem:[#allocation37_spill]] %s3267_s5 }
   0x7   :  { %3305 = sst [smem:[#allocation38_spill]] %s3268_s6 }
   0x8   :  { %3306 = sst [smem:[#allocation39_spill]] %s3269_s7 }
   0x9   :  { %3307 = sst [smem:[#allocation40_spill]] %s3270_s8 }
   0xa   :  { %3308 = sst [smem:[#allocation41_spill]] %s3271_s9 }
   0xb   :  { %3309 = sst [smem:[#allocation42_spill]] %s3272_s10 }
   0xc   :  { %3310 = sst [smem:[#allocation43_spill]] %s3273_s11 }
   0xd   :  { %3311 = sst [smem:[#allocation44_spill]] %s3274_s12 }
   0xe   :  { %3312 = sst [smem:[#allocation45_spill]] %s3275_s13 }
   0xf   :  { %18 = vsyncpa [#allocation4], 0 }
  0x10   :  { %20 = vsyncpa [#allocation4 + $0x1], 0 }
  0x11   :  { %21 = vsyncpa [#allocation7], 0 }
  0x12   :  { %23 = vsyncpa [#allocation7 + $0x1], 0 }
  0x13   :  { %24 = vsyncpa [#allocation10], 0 }
  0x14   :  { %26 = vsyncpa [#allocation10 + $0x1], 0 }
  0x15   :  { %27 = vsyncpa [#allocation5], 0 }
  0x16   :  { %29 = vsyncpa [#allocation5 + $0x1], 0  ;;  %s2662_s25 = smov 0   ;;  %s2664_s26 = smov 0  }
  0x17   :  { %s2666_s27 = smov 0   ;;  %s2668_s28 = smov 0  }
  0x18   :  { %s2670_s29 = smov 0   ;;  %s2672_s30 = smov 0  }
  0x19   :  { %s2674_s14 = smov 0   ;;  %s2676_s15 = smov 0  }
  0x1a   :  { %s2678_s16 = smov 0   ;;  %s2680_s17 = smov 0  }
  0x1b   :  { %s2682_s18 = smov 0  }
  0x1c LB: > { %3313 = sst [smem:[#allocation17_spill]] %s2535_s26  ;;  %s44_s19 = sadd.s32 1, %s2563_s16  ;;  %s2571_s18 = sphi %s2682_s18, %s35_s18   ;;  %s2567_s17 = sphi %s2680_s17, %s3390_s17   ;;  %s2563_s16 = sphi %s2678_s16, %s3389_s16   ;;  %s2559_s15 = sphi %s2676_s15, %s3388_s15   ;;  %s2555_s14 = sphi %s2674_s14, %s3387_s14   ;;  %s2551_s30 = sphi %s2672_s30, %s3386_s30   ;;  %s2547_s29 = sphi %s2670_s29, %s3385_s29   ;;  %s2543_s28 = sphi %s2668_s28, %s3384_s28   ;;  %s2539_s27 = sphi %s2666_s27, %s3383_s27   ;;  %s2535_s26 = sphi %s2664_s26, %s3382_s26   ;;  %s2531_s25 = sphi %s2662_s25, %s3381_s25  }
  0x1d   : > { %3314 = sst [smem:[#allocation18_spill]] %s2539_s27  ;;  %p3281_p0 = scmp.eq.s32.totalorder %s2571_s18, 0 }
  0x1e   : > { %3315 = sst [smem:[#allocation19_spill]] %s2543_s28  ;;  %p2719_p1 = scmp.ge.s32.totalorder %s44_s19, 2 }
  0x1f   : > { %3316 = sst [smem:[#allocation20_spill]] %s2547_s29  ;;  %s158_s21 = sadd.s32 1, %s2539_s27 }
  0x20   : > { %3317 = sst [smem:[#allocation21_spill]] %s2551_s30  ;;  %p165_p2 = scmp.ne.s32.totalorder %s2539_s27, %s2535_s26 }
  0x21   : > { %3318 = sst [smem:[#allocation22_spill]] %s2555_s14  ;;  %s3392_s19 = smov (%p2719_p1, %s44_s19), 0 }
  0x22   : > { %3319 = sst [smem:[#allocation23_spill]] %s2559_s15  ;;  %p167_p4 = por %p165_p2, %p3281_p0 }
  0x23   : > { %3320 = sst [smem:[#allocation24_spill]] %s2563_s16  ;;  %s155_s22 = ssub.s32 %s2563_s16, %s3392_s19 }
  0x24   : > { %3321 = sst [smem:[#allocation25_spill]] %s2567_s17  ;;  %p3280_p5 = scmp.lt.s32.totalorder %s2571_s18, 4 }
  0x25   : > { %s3322_s20 = scalar_select %p2719_p1, 1, 0 }
  0x26   : > { %3323 = sst [smem:[#allocation26_spill]] %s3392_s19  ;;  %p156_p6 = scmp.eq.s32.totalorder %s155_s22, 0 }
  0x27   : > { %s3282_s23 = sand.u32 1, %s2571_s18   ;;  %s2739_s24 = sand.u32 1, %s2539_s27  }
  0x28   : > { %s2742_s13 = scalar_select %p156_p6, %s2539_s27, %s158_s21  }
  0x29   : > { %s2745_s15 = sshll.u32 %s2563_s16, 4  ;;  %s3325_s4 = sld [smem:[#allocation36_spill]] }
  0x2a   : > { %3324 = sst [smem:[#allocation27_spill]] %s2742_s13  ;;  %s472_s19 = scalar_lea.vmem [#allocation6], %s2739_s24 }
  0x2b   : > { %s479_s22 = sshll.u32 %s472_s19, 4  ;;  %p2758_p7 = pnand %p3280_p5, %p167_p4  ;;  %s2754_s22 = int_to_ptr.vmem [resolvable:$true] %s479_s22 }
  0x2c   : > { %s2766_s11 = scalar_lea.sflag [#allocation7], %s3282_s23 }
  0x2d   : > { %s3326_s21 = scalar_select %p2758_p7, 1, 0 }
  0x2e   : > { %p2772_p11 = pneg %p2758_p7 }
  0x2f   : > { %s2751_s10 = scalar_lea.hbm %s3325_s4, %s2745_s15  ;;  %s2296_s27 = scalar_lea.hbm %s3325_s4, 32 }
  0x30   : > { %s2291_s12 = scalar_lea.hbm %s2751_s10, 16  ;;  %p2297_p2 = scmp.lt.u32.totalorder %s2751_s10, %s3325_s4 }
  0x31   : > { %p2292_p10 = scmp.ne.s32.totalorder %s2751_s10, %s2291_s12  ;;  %p2298_p4 = scmp.lt.u32.totalorder %s2296_s27, %s2291_s12 }
  0x32   : > { %p2300_p5 = scmp.lt.u32.totalorder %s2291_s12, %s2751_s10 }
  0x33   : > { %p2294_p12 = pnand %p2772_p11, %p2292_p10  ;;  %p2299_p6 = por %p2298_p4, %p2297_p2 }
  0x35   : > { %p2295_p13 = pneg %p2294_p12  ;;  %p2301_p3 = por %p2300_p5, %p2299_p6 }
  0x37   : > { %p2302_p0 = pnand %p2301_p3, %p2295_p13 }
  0x39   : > { %2305 = shalt.err (!%p2302_p0)
}
  0x3a   : > { %s2306_s23 = scalar_lea.vmem %s2754_s22, 16  ;;  %s2573_s13 = smov [#allocation6]  }
  0x3b   : > { %p2307_p10 = scmp.ne.s32.totalorder %s2754_s22, %s2306_s23  ;;  %s2311_s19 = sshll.u32 %s2573_s13, 4  ;;  %s2312_s19 = int_to_ptr.vmem [resolvable:$false] %s2311_s19 }
  0x3c   : > { %s2313_s7 = scalar_lea.vmem %s2312_s19, 32  ;;  %p2314_p9 = scmp.lt.s32.totalorder %s2754_s22, %s2312_s19 }
  0x3d   : > { %p2309_p12 = pnand %p2307_p10, %p2772_p11  ;;  %p2315_p1 = scmp.lt.s32.totalorder %s2313_s7, %s2306_s23 }
  0x3f   : > { %p2310_p8 = pneg %p2309_p12  ;;  %p2316_p2 = por %p2315_p1, %p2314_p9 }
  0x41   : > { %p2317_p4 = pnand %p2316_p2, %p2310_p8 }
  0x43   : > { %2320 = shalt.err (!%p2317_p4)
}
  0x44   : > { %2146 = dma.hbm_to_vmem [thread:$0]  (!%p2758_p7), %s2751_s10, 16, %s2754_s22, %s2766_s11  }
  0x45   : > { %p3328_p0 = scmp.lt.s32.totalorder %s2571_s18, 5  ;;  %p3329_p3 = scmp.ge.s32.totalorder %s2571_s18, 1 }
  0x46   : > { %s3331_s6 = sld [smem:[#allocation38_spill]]  ;;  %s506_s13 = scalar_lea.vmem [#allocation9], %s2739_s24 }
  0x47   : > { %p2800_p5 = pnand %p3329_p3, %p3328_p0  ;;  %s513_s19 = sshll.u32 %s506_s13, 4  ;;  %s514_s19 = int_to_ptr.vmem [resolvable:$true] %s513_s19 }
  0x48   : > { %s3332_s7 = sand.u32 1, %s2571_s18  }
  0x49   : > { %s3330_s9 = scalar_select %p2800_p5, 1, 0 }
  0x4a   : > { %s2813_s10 = scalar_lea.sflag [#allocation10], %s3332_s7 }
  0x4c   : > { %s2808_s12 = scalar_lea.hbm %s3331_s6, %s2745_s15  ;;  %s2326_s27 = scalar_lea.hbm %s3331_s6, 32 }
  0x4d   : > { %s2321_s22 = scalar_lea.hbm %s2808_s12, 16  ;;  %p2327_p13 = scmp.lt.u32.totalorder %s2808_s12, %s3331_s6 }
  0x4e   : > { %p2322_p1 = scmp.ne.s32.totalorder %s2808_s12, %s2321_s22  ;;  %p2328_p6 = scmp.lt.u32.totalorder %s2326_s27, %s2321_s22 }
  0x4f   : > { %p2330_p12 = scmp.lt.u32.totalorder %s2321_s22, %s2808_s12 }
  0x50   : > { %p2324_p8 = pnand %p2322_p1, %p2772_p11  ;;  %p2329_p10 = por %p2328_p6, %p2327_p13 }
  0x52   : > { %p2325_p9 = pneg %p2324_p8  ;;  %p2331_p2 = por %p2330_p12, %p2329_p10 }
  0x54   : > { %p2332_p4 = pnand %p2331_p2, %p2325_p9 }
  0x56   : > { %2335 = shalt.err (!%p2332_p4)
}
  0x57   : > { %s2336_s13 = scalar_lea.vmem %s514_s19, 16  ;;  %s2574_s7 = smov [#allocation9]  }
  0x58   : > { %p2337_p0 = scmp.ne.s32.totalorder %s514_s19, %s2336_s13  ;;  %s2341_s2 = sshll.u32 %s2574_s7, 4  ;;  %s2342_s2 = int_to_ptr.vmem [resolvable:$false] %s2341_s2 }
  0x59   : > { %s2343_s3 = scalar_lea.vmem %s2342_s2, 32  ;;  %p2344_p8 = scmp.lt.s32.totalorder %s514_s19, %s2342_s2 }
  0x5a   : > { %p2339_p3 = pnand %p2337_p0, %p2772_p11  ;;  %p2345_p5 = scmp.lt.s32.totalorder %s2343_s3, %s2336_s13 }
  0x5c   : > { %p2340_p1 = pneg %p2339_p3  ;;  %p2346_p7 = por %p2345_p5, %p2344_p8 }
  0x5e   : > { %p2347_p6 = pnand %p2346_p7, %p2340_p1 }
  0x60   : > { %2350 = shalt.err (!%p2347_p6)
}
  0x61   : > { %p3333_p13 = scmp.ne.s32.totalorder %s3326_s21, 0  ;;  %s2834_s1 = sadd.s32 4294967295, %s2571_s18  }
  0x62   : > { %s1932_s2 = sadd.s32 4294967294, %s2571_s18   ;;  %s47_s4 = sadd.s32 1, %s2567_s17 }
  0x63   : > { %2152 = dma.hbm_to_vmem [thread:$0]  (!%p3333_p13), %s2808_s12, 16, %s514_s19, %s2813_s10  }
  0x64   : > { %p3334_p7 = scmp.ne.s32.totalorder %s3322_s20, 0  ;;  %s54_s22 = sadd.s32 1, %s2551_s30 }
  0x65   : > { %p61_p5 = scmp.ne.s32.totalorder %s2551_s30, %s2547_s29  ;;  %p67_p10 = scmp.ne.s32.totalorder %s2547_s29, %s2543_s28 }
  0x66   : > { %s3394_s4 = smov (!%p3334_p7, %s47_s4), %s2567_s17  ;;  %p3335_p12 = scmp.eq.s32.totalorder %s2571_s18, 0 }
  0x67   : > { %p49_p9 = scmp.ge.s32.totalorder %s3394_s4, 2  ;;  %p68_p4 = scmp.eq.s32.totalorder %s2834_s1, 0 }
  0x68   : > { %p2848_p2 = por %p3335_p12, %p61_p5  ;;  %p3339_p3 = scmp.ne.s32.totalorder %s2535_s26, %s2531_s25 }
  0x69   : > { %s3396_s4 = smov (%p49_p9, %s3394_s4), 0  ;;  %p2858_p0 = por %p68_p4, %p67_p10 }
  0x6a   : > { %3337 = sst [smem:[#allocation28_spill]] %s3396_s4  ;;  %p2865_p1 = por %p3339_p3, %p68_p4 }
  0x6b   : > { %s3338_s20 = scalar_select %p2858_p0, 1, 0 }
  0x6c   : > { %s3340_s19 = scalar_select %p2865_p1, 1, 0 }
  0x6d   : > { %s51_s27 = ssub.s32 %s2567_s17, %s3396_s4  ;;  %p403_p8 = scmp.eq.s32.totalorder %s2834_s1, 3 }
  0x6e   : > { %3341 = sst [smem:[#allocation29_spill]] %s3340_s19  ;;  %p52_p6 = scmp.eq.s32.totalorder %s51_s27, 0 }
  0x6f   : > { %p409_p7 = scmp.eq.s32.totalorder %s1932_s2, 3  ;;  %p2872_p9 = por %p403_p8, %p61_p5 }
  0x70   : > { %s429_s13 = sand.u32 1, %s2551_s30   ;;  %s1936_s6 = sshll.u32 %s2567_s17, 7 }
  0x71   : > { %s3342_s23 = scalar_select %p2872_p9, 1, 0 }
  0x72   : > { %s2878_s7 = scalar_select %p52_p6, %s2551_s30, %s54_s22  }
  0x73   : > { %p2883_p12 = por %p409_p7, %p67_p10  ;;  %s1935_s25 = sshll.u32 %s429_s13, 3 }
  0x74   : > { %3343 = sst [smem:[#allocation30_spill]] %s2878_s7  ;;  %s3346_s0 = sld [smem:[#allocation32_spill]] }
  0x75   : > { %s3344_s3 = scalar_select %p2883_p12, 1, 0 }
  0x76   : > { %s433_s2 = scalar_lea.vmem [#allocation3], %s1935_s25  ;;  %p3347_p5 = scmp.lt.s32.totalorder %s2571_s18, 4 }
  0x77   : > { %3345 = sst [smem:[#allocation31_spill]] %s3344_s3  ;;  %s440_s27 = sshll.u32 %s433_s2, 4  ;;  %s2901_s27 = int_to_ptr.vmem [resolvable:$true] %s440_s27 }
  0x78   : > { %p2897_p4 = pnand %p3347_p5, %p2848_p2  ;;  %s3349_s5 = sld [smem:[#allocation37_spill]] }
  0x79   : > { %s430_s19 = scalar_lea.sflag [#allocation4], %s429_s13 }
  0x7a   : > { %s2891_s4 = scalar_lea.hbm %s3346_s0, %s1936_s6  ;;  %p2353_p3 = pneg %p2897_p4 }
  0x7b   : > { %s2351_s7 = scalar_lea.hbm %s2891_s4, 128  ;;  %s2356_s2 = scalar_lea.hbm %s3346_s0, 256 }
  0x7c   : > { %p2352_p10 = scmp.ne.s32.totalorder %s2891_s4, %s2351_s7  ;;  %p2357_p6 = scmp.lt.u32.totalorder %s2891_s4, %s3346_s0 }
  0x7d   : > { %p2358_p7 = scmp.lt.u32.totalorder %s2356_s2, %s2351_s7  ;;  %p2360_p12 = scmp.lt.u32.totalorder %s2351_s7, %s2891_s4 }
  0x7e   : > { %s2907_s6 = scalar_lea.hbm %s3349_s5, %s2745_s15  ;;  %p2354_p2 = pnand %p2353_p3, %p2352_p10 }
  0x7f   : > { %p2359_p5 = por %p2358_p7, %p2357_p6 }
  0x80   : > { %p2355_p8 = pneg %p2354_p2 }
  0x81   : > { %p2361_p9 = por %p2360_p12, %p2359_p5 }
  0x83   : > { %p2362_p1 = pnand %p2361_p9, %p2355_p8 }
  0x85   : > { %2365 = shalt.err (!%p2362_p1)
}
  0x86   : > { %s2366_s17 = scalar_lea.vmem %s2901_s27, 128  ;;  %s2575_s13 = smov [#allocation3]  }
  0x87   : > { %p2367_p10 = scmp.ne.s32.totalorder %s2901_s27, %s2366_s17  ;;  %s2371_s14 = sshll.u32 %s2575_s13, 4  ;;  %s2372_s14 = int_to_ptr.vmem [resolvable:$false] %s2371_s14 }
  0x88   : > { %s2373_s30 = scalar_lea.vmem %s2372_s14, 256  ;;  %p2374_p13 = scmp.lt.s32.totalorder %s2901_s27, %s2372_s14 }
  0x89   : > { %p2369_p2 = pnand %p2367_p10, %p2353_p3  ;;  %p2375_p6 = scmp.lt.s32.totalorder %s2373_s30, %s2366_s17 }
  0x8b   : > { %p2370_p0 = pneg %p2369_p2  ;;  %p2376_p7 = por %p2375_p6, %p2374_p13 }
  0x8d   : > { %p2377_p12 = pnand %p2376_p7, %p2370_p0 }
  0x8f   : > { %2380 = shalt.err (!%p2377_p12)
}
  0x90   : > { %2143 = dma.hbm_to_vmem [thread:$0]  (!%p2897_p4), %s2891_s4, 128, %s2901_s27, %s430_s19  }
  0x91   : > { %s489_s7 = scalar_lea.vmem [#allocation8], %s2739_s24  ;;  %s3350_s8 = sld [smem:[#allocation40_spill]] }
  0x92   : > { %s496_s3 = sshll.u32 %s489_s7, 4  ;;  %s2381_s17 = scalar_lea.hbm %s2907_s6, 16  ;;  %s497_s3 = int_to_ptr.vmem [resolvable:$true] %s496_s3 }
  0x93   : > { %p2382_p13 = scmp.ne.s32.totalorder %s2907_s6, %s2381_s17  ;;  %s2386_s14 = scalar_lea.hbm %s3349_s5, 32 }
  0x94   : > { %p2387_p9 = scmp.lt.u32.totalorder %s2907_s6, %s3349_s5  ;;  %p2388_p4 = scmp.lt.u32.totalorder %s2386_s14, %s2381_s17 }
  0x95   : > { %p2384_p0 = pnand %p2382_p13, %p2772_p11  ;;  %p2390_p8 = scmp.lt.u32.totalorder %s2381_s17, %s2907_s6 }
  0x96   : > { %p2389_p3 = por %p2388_p4, %p2387_p9 }
  0x97   : > { %s2939_s2 = scalar_lea.hbm %s3350_s8, %s2745_s15  ;;  %p2385_p1 = pneg %p2384_p0 }
  0x98   : > { %p2391_p5 = por %p2390_p8, %p2389_p3 }
  0x9a   : > { %p2392_p10 = pnand %p2391_p5, %p2385_p1 }
  0x9c   : > { %2395 = shalt.err (!%p2392_p10)
}
  0x9d   : > { %s2396_s15 = scalar_lea.vmem %s497_s3, 16  ;;  %s2576_s4 = smov [#allocation8]  }
  0x9e   : > { %p2397_p2 = scmp.ne.s32.totalorder %s497_s3, %s2396_s15  ;;  %s2401_s27 = sshll.u32 %s2576_s4, 4  ;;  %s2402_s27 = int_to_ptr.vmem [resolvable:$false] %s2401_s27 }
  0x9f   : > { %s2403_s19 = scalar_lea.vmem %s2402_s27, 32  ;;  %p2404_p12 = scmp.lt.s32.totalorder %s497_s3, %s2402_s27 }
  0xa0   : > { %p2399_p6 = pnand %p2397_p2, %p2772_p11  ;;  %p2405_p13 = scmp.lt.s32.totalorder %s2403_s19, %s2396_s15 }
  0xa2   : > { %p2400_p7 = pneg %p2399_p6  ;;  %p2406_p0 = por %p2405_p13, %p2404_p12 }
  0xa4   : > { %p2407_p4 = pnand %p2406_p0, %p2400_p7 }
  0xa6   : > { %2410 = shalt.err (!%p2407_p4)
}
  0xa7   : > { %p3351_p9 = scmp.ne.s32.totalorder %s3326_s21, 0  ;;  %s531_s0 = scalar_lea.vmem [#allocation11], %s2739_s24 }
  0xa8   : > { %s538_s7 = sshll.u32 %s531_s0, 4  ;;  %s2411_s12 = scalar_lea.hbm %s2939_s2, 16  ;;  %s539_s7 = int_to_ptr.vmem [resolvable:$true] %s538_s7 }
  0xa9   : > { %2149 = dma.hbm_to_vmem [thread:$0]  (!%p3351_p9), %s2907_s6, 16, %s497_s3, %s2766_s11  }
  0xaa   : > { %p2412_p1 = scmp.ne.s32.totalorder %s2939_s2, %s2411_s12  ;;  %s2416_s22 = scalar_lea.hbm %s3350_s8, 32 }
  0xab   : > { %p2417_p5 = scmp.lt.u32.totalorder %s2939_s2, %s3350_s8  ;;  %p2418_p10 = scmp.lt.u32.totalorder %s2416_s22, %s2411_s12 }
  0xac   : > { %p2414_p3 = pnand %p2412_p1, %p2772_p11  ;;  %p2420_p6 = scmp.lt.u32.totalorder %s2411_s12, %s2939_s2 }
  0xad   : > { %p2419_p2 = por %p2418_p10, %p2417_p5 }
  0xae   : > { %p2415_p8 = pneg %p2414_p3 }
  0xaf   : > { %p2421_p7 = por %p2420_p6, %p2419_p2 }
  0xb1   : > { %p2422_p12 = pnand %p2421_p7, %p2415_p8 }
  0xb3   : > { %2425 = shalt.err (!%p2422_p12)
}
  0xb4   : > { %s2426_s24 = scalar_lea.vmem %s539_s7, 16  ;;  %s2577_s11 = smov [#allocation11]  }
  0xb5   : > { %p2427_p13 = scmp.ne.s32.totalorder %s539_s7, %s2426_s24  ;;  %s2431_s6 = sshll.u32 %s2577_s11, 4  ;;  %s2432_s6 = int_to_ptr.vmem [resolvable:$false] %s2431_s6 }
  0xb6   : > { %s2433_s3 = scalar_lea.vmem %s2432_s6, 32  ;;  %p2434_p1 = scmp.lt.s32.totalorder %s539_s7, %s2432_s6 }
  0xb7   : > { %p2429_p0 = pnand %p2427_p13, %p2772_p11  ;;  %p2435_p3 = scmp.lt.s32.totalorder %s2433_s3, %s2426_s24 }
  0xb9   : > { %p2430_p4 = pneg %p2429_p0  ;;  %p2436_p9 = por %p2435_p3, %p2434_p1 }
  0xbb   : > { %p2437_p5 = pnand %p2436_p9, %p2430_p4 }
  0xbd   : > { %2440 = shalt.err (!%p2437_p5)
}
  0xbe   : > { %p3352_p10 = scmp.ne.s32.totalorder %s3326_s21, 0  ;;  %p3353_p8 = scmp.ne.s32.totalorder %s3330_s9, 0 }
  0xbf   : > { %s2981_s16 = sand.u32 (!%p3353_p8), 1, %s2547_s29   ;;  %p3354_p11 = scmp.ne.s32.totalorder (!%p3353_p8), %s3338_s20, 0 }
  0xc0   : > { %2155 = dma.hbm_to_vmem [thread:$0]  (!%p3352_p10), %s2939_s2, 16, %s539_s7, %s2813_s10  }
  0xc1   : > { %573 = sbr.rel (%p3353_p8) target bundleno = 3926 (0xf56), region = 72  ;;  %s1942_s30 = sshll.u32 (!%p3353_p8), %s2981_s16, 3 }
  0xc2   : > { %s576_s15 = scalar_lea.sflag (!%p3353_p8), [#allocation4], %s2981_s16  ;;  %s579_s4 = scalar_lea.vmem (!%p3353_p8), [#allocation3], %s1942_s30 }
  0xc8   : > { %2514 = dma.done.wait (%p3354_p11), %s576_s15, 128  }
  0xc9   : > { %2516 = vsyncadd (%p3354_p11), %s576_s15, 4294967168  ;;  %s3355_s21 = sld [smem:[#allocation29_spill]]  ;;  %s584_s10 = sand.u32 1, %s2834_s1  }
  0xca   : > { %s2991_s9 = sand.u32 1, %s2535_s26   ;;  %s585_s2 = scalar_lea.sflag [#allocation7], %s584_s10 }
  0xcf   : > { %p3356_p9 = scmp.ne.s32.totalorder %s3355_s21, 0 }
  0xd1   : > { %2518 = dma.done.wait (%p3356_p9), %s585_s2, 32  }
  0xd2   : > { %2520 = vsyncadd (%p3356_p9), %s585_s2, 4294967264  ;;  %s601_s20 = scalar_lea.sflag [#allocation10], %s584_s10 }
  0xd3   : > { %2522 = dma.done.wait (%p3356_p9), %s601_s20, 32  }
  0xd4   : > { %2524 = vsyncadd (%p3356_p9), %s601_s20, 4294967264  ;;  %s3357_s1 = sld [smem:[#allocation22_spill]]  ;;  %s3360_s21 = sld [smem:[#allocation35_spill]] }
  0xd5   : > { %s3359_s11 = sld [smem:[#allocation33_spill]]  ;;  %s3361_s0 = sld [smem:[#allocation39_spill]] }
  0xd6   : > { %s3362_s29 = sld [smem:[#allocation41_spill]]  ;;  %s3363_s14 = sld [smem:[#allocation42_spill]] }
  0xd7   : > { %s3364_s3 = sld [smem:[#allocation43_spill]]  ;;  %s3365_s28 = sld [smem:[#allocation44_spill]] }
  0xda   : > { %p702_p2 = scmp.lt.s32.totalorder %s3357_s1, 1  ;;  %p1952_p6 = scmp.ne.s32.totalorder %s3357_s1, 0 }
  0xdb   : > { %v739_v0 = vld [vmem:[%s579_s4] sm:$0xff] (!%p1952_p6)  ;;  %vm740_vm0 = vcmask (!%p1952_p6), 261120  }
  0xdc   : > { %s3006_s7 = scalar_select %p702_p2, %s3357_s1, 1 }
  0xdd   : > { %738 = sbr.rel (%p1952_p6) target bundleno = 228 (0xe4), region = 96  ;;  %741 = vst.msk [vmem:[#allocation2] sm:$0xff] (!%p1952_p6), %vm740_vm0, %v739_v0 }
  0xde   : > { %s1989_s12 = sshll.u32 %s3006_s7, 4  ;;  %s1992_s27 = sshll.u32 %s3006_s7, 5 }
  0xdf   : > { %s706_s6 = scalar_lea.vmem %s3359_s11, %s1989_s12  ;;  %s3019_s10 = scalar_lea.vmem %s3360_s21, %s1989_s12 }
  0xe0   : > { %s3024_s19 = scalar_lea.vmem %s3361_s0, %s1989_s12  ;;  %s3030_s25 = scalar_lea.vmem %s3362_s29, %s1992_s27 }
  0xe1   : > { %s727_s24 = scalar_lea.vmem %s3363_s14, %s3006_s7  ;;  %s730_s15 = scalar_lea.vmem %s3364_s3, %s3006_s7 }
  0xe2   : > { %s733_s2 = scalar_lea.vmem %s3365_s28, %s3006_s7  ;;  %s611_s0 = scalar_lea.vmem [#allocation11], %s2991_s9 }
  0xe3   : > { %s3045_s12 = scalar_lea.vmem [#allocation12], %s1942_s30 }
  0xe4 PF: > { %v2263_v1 = vld [vmem:[%s706_s6] sm:$0xff]   ;;  %v2578_v2 = vmov 0.0   ;;  %v2264_v3 = vld [vmem:[%s706_s6 + $0x8] sm:$0xff]   ;;  %vm2579_vm1 = vmmov 0   ;;  %vm767_vm2 = vcmask 261120   ;;  %s3366_s26 = sld [smem:[#allocation34_spill]] }
  0xe5   : > { %2028 = vmatprep.subr.bf16.mxu1 %v2578_v2  ;;  %2042 = vmatprep.subr.bf16.mxu0 %v2578_v2  ;;  %v3052_v4 = vld [vmem:[#allocation2] sm:$0xff]  ;;  %s2580_s29 = smov 120   ;;  %s2581_s30 = smov 96   ;;  %vm819_vm3 = vcmask 64512   ;;  %vm884_vm4 = vcmask 1043456   ;;  %vm1598_vm5 = vcmask 523264  }
  0xe6   : > { %2029 = vmatpush3.bf16.msra.mxu1 %v2263_v1  ;;  %2032 = vmatprep.mubr.msk.bf16.mxu1 %vm2579_vm1, %v2578_v2  ;;  %v743_v5 = vpack.c.bf16 %v3052_v4, %v3052_v4  ;;  %s2582_s4 = smov 88   ;;  %s2583_s27 = smov 64   ;;  %v811_v52 = vld [vmem:[%s3019_s10] sm:$0xf]  ;;  %v812_v54 = vld [vmem:[%s3019_s10 + $0x4] sm:$0xf] }
  0xe7   : > { %2030 = vmatprep.subr.bf16.mxu1 %v2578_v2  ;;  %2044 = vmatprep.mubr.msk.bf16.mxu0 %vm2579_vm1, %v2578_v2  ;;  %s2584_s1 = smov 56   ;;  %s2585_s13 = smov 112   ;;  %v1091_v53 = vsel %vm884_vm4, %v811_v52, 0  ;;  %v1045_v55 = vsel %vm884_vm4, %v812_v54, 0 }
  0xe8   : > { %s2586_s6 = smov 80   ;;  %s2587_s20 = smov 72  }
  0xe9   : > { %s2588_s17 = smov 104   ;;  %s2589_s22 = smov 48  }
  0xea   : > { %2031 = vmatpush3.bf16.msra.mxu1 %v2264_v3  ;;  %s3367_s28 = scalar_lea.vmem %s3366_s26, %s3006_s7  ;;  %s2590_s14 = smov 40  }
  0xeb   : > { %2036 = vmatprep.subr.bf16.mxu1 %v2578_v2  ;;  %v1953_v6 = vld [vmem:[%s3367_s28] ss:$0 sm:$0xff]  ;;  %s3370_s11 = scalar_lea.vmem [#allocation9], %s2991_s9  ;;  %s3374_s28 = sld [smem:[#allocation22_spill]] }
  0xed   : > { %2033 = vmatmul.mubr.msk.bf16.vlgmr.msra.gmra.mrb[0].mxu1 %vm767_vm2, %v743_v5 }
  0xee   : > { %2038 = vmatprep.mubr.msk.bf16.mxu1 %vm2579_vm1, %v2578_v2 }
  0xf1   : > { %p1984_p7 = scmp.ne.s32.totalorder %s3374_s28, 1 }
 0x1c0   : > { %v805_v7 = vpop.f32.mrb[0].mxu1 }
 0x1c1   : > { %v806_v8 = vadd.f32 %v1953_v6, %v805_v7  ;;  %v2034_v9 = vpop.f32.mrb[1].mxu1 }
 0x1c2   : > { %v808_v10 = vpop.f32.mrb[2].mxu1 }
 0x1c3   : > { %v3068_v11 = vpack.c.bf16 %v806_v8, %v806_v8  ;;  %v2035_v12 = vpop.f32.mrb[3].mxu1 }
 0x1c5   : > { %929 = vrot.lane.b32.xlu1 %v3068_v11, %s2580_s29  ;;  %817 = vrot.lane.b32.xlu0 %v3068_v11, %s2581_s30 }
 0x1c9   : > { %931 = vrot.lane.b32.xlu0 %v3068_v11, %s2582_s4 }
 0x237   : > { %v818_v13 = vpop.permute.xlu0 %817  ;;  %v930_v17 = vpop.permute.xlu1 %929 }
 0x238   : > { %v824_v14 = vsel %vm819_vm3, %v818_v13, 0 }
 0x239   : > { %2037 = vmatpush3.bf16.xpose.msra.mxu1 %v824_v14 }
 0x23a   : > { %2048 = vmatprep.subr.bf16.mxu1 %v2578_v2 }
 0x23b   : > { %v932_v15 = vpop.permute.xlu0 %931 }
 0x23c   : > { %v937_v16 = vsel %vm819_vm3, %v932_v15, 0 }
 0x240   : > { %2039 = vmatmul.mubr.msk.bf16.vlgmr.msra.gmra.mrb[4].mxu1 %vm819_vm3, %v3068_v11 }
 0x241   : > { %2049 = vmatpush3.bf16.xpose.msra.mxu1 %v937_v16  ;;  %2050 = vmatprep.mubr.msk.bf16.mxu1 %vm2579_vm1, %v2578_v2 }
 0x242   : > { %2060 = vmatprep.subr.bf16.mxu1 %v2578_v2 }
 0x248   : > { %2051 = vmatmul.mubr.msk.bf16.vlgmr.msra.gmra.mrb[8].mxu1 %vm819_vm3, %v930_v17 }
 0x249   : > { %2062 = vmatprep.mubr.msk.bf16.mxu1 %vm2579_vm1, %v2578_v2  ;;  %2061 = vmatpush3.bf16.msra.mxu1 %v1045_v55 }
 0x24a   : > { %2072 = vmatprep.subr.bf16.mxu1 %v2578_v2 }
 0x313   : > { %v860_v18 = vpop.f32.mrb[4].mxu1 }
 0x314   : > { %v866_v19 = vmul.f32 0.35355338, %v860_v18  ;;  %v2040_v20 = vpop.f32.mrb[5].mxu1 }
 0x315   : > { %v863_v21 = vpop.f32.mrb[6].mxu1 }
 0x316   : > { %v2041_v22 = vpop.f32.mrb[7].mxu1  ;;  %v867_v23 = vsel %vm819_vm3, %v866_v19, -inf }
 0x317   : > { %868 = vmax.xlane.f32.xlu1 %v867_v23 }
 0x31b   : > { %v973_v24 = vpop.f32.mrb[8].mxu1 }
 0x31c   : > { %v979_v25 = vmul.f32 0.35355338, %v973_v24  ;;  %v2052_v26 = vpop.f32.mrb[9].mxu1 }
 0x31d   : > { %v976_v27 = vpop.f32.mrb[10].mxu1 }
 0x31e   : > { %v2053_v28 = vpop.f32.mrb[11].mxu1  ;;  %v980_v29 = vsel %vm819_vm3, %v979_v25, -inf }
 0x31f   : > { %981 = vmax.xlane.f32.xlu0 %v980_v29 }
 0x3a4   : > { %v869_v30 = vpop.xlane.xlu1 %868 }
 0x3a5   : > { %v870_v31 = vsub.f32 %v866_v19, %v869_v30 }
 0x3a7   : > { %v871_v32 = vmul.f32 1.442695, %v870_v31 }
 0x3a9   : > { %2271 = vpow2.f32 %v871_v32 }
 0x3ac   : > { %v982_v33 = vpop.xlane.xlu0 %981 }
 0x3ad   : > { %v983_v34 = vsub.f32 %v979_v25, %v982_v33 }
 0x3af   : > { %v984_v35 = vmul.f32 1.442695, %v983_v34 }
 0x3b1   : > { %2273 = vpow2.f32 %v984_v35 }
 0x3b3   : > { %v2272_v36 = vpop.eup %2271 }
 0x3b4   : > { %v873_v37 = vsel %vm819_vm3, %v2272_v36, 0.0 }
 0x3b5   : > { %874 = vadd.xlane.f32.xlu0 %v873_v37  ;;  %v813_v37 = vld [vmem:[%s3019_s10 + $0x8] sm:$0xf] }
 0x3bb   : > { %v2274_v38 = vpop.eup %2273 }
 0x3bc   : > { %v986_v39 = vsel %vm819_vm3, %v2274_v38, 0.0 }
 0x3bd   : > { %987 = vadd.xlane.f32.xlu1 %v986_v39 }
 0x3cb   : > { %879 = vrot.lane.b32.xlu0 %v3068_v11, %s2583_s27 }
 0x3ce   : > { %992 = vrot.lane.b32.xlu1 %v3068_v11, %s2584_s1 }
 0x3cf   : > { %1133 = vrot.lane.b32.xlu0 %v3068_v11, %s2585_s13 }
 0x3d2   : > { %1135 = vrot.lane.b32.xlu1 %v3068_v11, %s2586_s6 }
 0x442   : > { %v875_v40 = vpop.xlane.xlu0 %874 }
 0x443   : > { %2275 = vrcp.f32 %v875_v40 }
 0x446   : > { %v880_v41 = vpop.permute.xlu0 %879 }
 0x447   : > { %v886_v42 = vsel %vm884_vm4, %v880_v41, 0 }
 0x448   : > { %2043 = vmatpush3.bf16.msra.mxu0 %v886_v42 }
 0x449   : > { %2054 = vmatprep.subr.bf16.mxu0 %v2578_v2 }
 0x44a   : > { %v988_v43 = vpop.xlane.xlu1 %987  ;;  %v1134_v6 = vpop.permute.xlu0 %1133 }
 0x44b   : > { %2277 = vrcp.f32 %v988_v43 }
 0x44d   : > { %v2276_v44 = vpop.eup %2275 }
 0x44e   : > { %v877_v45 = vmul.f32 %v2276_v44, %v2272_v36  ;;  %v993_v46 = vpop.permute.xlu1 %992 }
 0x44f   : > { %v998_v48 = vsel %vm884_vm4, %v993_v46, 0 }
 0x450   : > { %v878_v47 = vpack.c.bf16 %v877_v45, %v877_v45 }
 0x452   : > { %2045 = vmatmul.mubr.msk.bf16.vlgmr.msra.gmra.mrb[0].mxu0 %vm819_vm3, %v878_v47  ;;  %v1136_v61 = vpop.permute.xlu1 %1135 }
 0x453   : > { %2055 = vmatpush3.bf16.msra.mxu0 %v998_v48  ;;  %2056 = vmatprep.mubr.msk.bf16.mxu0 %vm2579_vm1, %v2578_v2  ;;  %v1141_v3 = vsel %vm819_vm3, %v1136_v61, 0 }
 0x454   : > { %2066 = vmatprep.subr.bf16.mxu0 %v2578_v2 }
 0x455   : > { %v2278_v49 = vpop.eup %2277 }
 0x456   : > { %v990_v50 = vmul.f32 %v2278_v49, %v2274_v38  ;;  %v1249_v38 = vsel %vm884_vm4, %v813_v37, 0 }
 0x458   : > { %v991_v51 = vpack.c.bf16 %v990_v50, %v990_v50 }
 0x45a   : > { %2057 = vmatmul.mubr.msk.bf16.vlgmr.msra.gmra.mrb[4].mxu0 %vm819_vm3, %v991_v51 }
 0x45b   : > { %2068 = vmatprep.mubr.msk.bf16.mxu0 %vm2579_vm1, %v2578_v2  ;;  %2067 = vmatpush3.bf16.msra.mxu0 %v1091_v53 }
 0x45c   : > { %2078 = vmatprep.subr.bf16.mxu0 %v2578_v2 }
 0x525   : > { %v922_v56 = vpop.f32.mrb[0].mxu0 }
 0x526   : > { %v928_v57 = vpack.c.bf16 %v922_v56, %v922_v56  ;;  %v2046_v58 = vpop.f32.mrb[1].mxu0 }
 0x527   : > { %v925_v59 = vpop.f32.mrb[2].mxu0 }
 0x528   : > { %v2047_v60 = vpop.f32.mrb[3].mxu0  ;;  %2069 = vmatmul.mubr.msk.bf16.vlgmr.msra.gmra.mrb[8].mxu0 %vm819_vm3, %v928_v57  ;;  %v814_v57 = vld [vmem:[%s3019_s10 + $0xc] sm:$0xf]  ;;  %s3368_s10 = scalar_lea.vmem [#allocation6], %s2991_s9 }
 0x529   : > { %2080 = vmatprep.mubr.msk.bf16.mxu0 %vm2579_vm1, %v2578_v2  ;;  %v1408_v58 = vsel %vm884_vm4, %v814_v57, 0 }
 0x52d   : > { %v1034_v62 = vpop.f32.mrb[4].mxu0 }
 0x52e   : > { %v1040_v63 = vpack.c.bf16 %v1034_v62, %v1034_v62  ;;  %v2058_v0 = vpop.f32.mrb[5].mxu0 }
 0x52f   : > { %v1037_v1 = vpop.f32.mrb[6].mxu0 }
 0x530   : > { %v2059_v5 = vpop.f32.mrb[7].mxu0  ;;  %2063 = vmatmul.mubr.msk.bf16.vlgmr.msra.gmra.mrb[12].mxu1 %vm819_vm3, %v1040_v63 }
 0x531   : > { %2073 = vmatpush3.bf16.xpose.msra.mxu1 %v1141_v3  ;;  %2074 = vmatprep.mubr.msk.bf16.mxu1 %vm2579_vm1, %v2578_v2 }
 0x532   : > { %2084 = vmatprep.subr.bf16.mxu1 %v2578_v2 }
 0x538   : > { %2075 = vmatmul.mubr.msk.bf16.vlgmr.msra.gmra.mrb[16].mxu1 %vm819_vm3, %v1134_v6 }
 0x539   : > { %2086 = vmatprep.mubr.msk.bf16.mxu1 %vm2579_vm1, %v2578_v2  ;;  %2085 = vmatpush3.bf16.msra.mxu1 %v1249_v38  ;;  %v2269_v38 = vld [vmem:[%s3030_s25 + $0x10] sm:$0xff]  }
 0x53a   : > { %2096 = vmatprep.subr.bf16.mxu1 %v2578_v2 }
 0x5fb   : > { %v1127_v7 = vpop.f32.mrb[8].mxu0 }
 0x5fc   : > { %v2070_v8 = vpop.f32.mrb[9].mxu0 }
 0x5fd   : > { %v1130_v9 = vpop.f32.mrb[10].mxu0 }
 0x5fe   : > { %v2071_v10 = vpop.f32.mrb[11].mxu0 }
 0x603   : > { %v1081_v12 = vpop.f32.mrb[12].mxu1 }
 0x604   : > { %v3119_v13 = vadd.f32 %v1127_v7, %v1081_v12  ;;  %v2064_v14 = vpop.f32.mrb[13].mxu1  ;;  %v1969_v12 = vld [vmem:[%s3368_s10] ss:$0 sm:$0xff] }
 0x605   : > { %v1084_v15 = vpop.f32.mrb[14].mxu1 }
 0x606   : > { %v2065_v16 = vpop.f32.mrb[15].mxu1 }
 0x60b   : > { %v1177_v17 = vpop.f32.mrb[16].mxu1 }
 0x60c   : > { %v1183_v18 = vmul.f32 0.35355338, %v1177_v17  ;;  %v2076_v19 = vpop.f32.mrb[17].mxu1 }
 0x60d   : > { %v1180_v20 = vpop.f32.mrb[18].mxu1 }
 0x60e   : > { %v2077_v21 = vpop.f32.mrb[19].mxu1  ;;  %v1184_v22 = vsel %vm819_vm3, %v1183_v18, -inf }
 0x60f   : > { %1185 = vmax.xlane.f32.xlu1 %v1184_v22 }
 0x620   : > { %1294 = vrot.lane.b32.xlu1 %v3068_v11, %s2587_s20 }
 0x624   : > { %1292 = vrot.lane.b32.xlu1 %v3068_v11, %s2588_s17 }
 0x69c   : > { %v1186_v23 = vpop.xlane.xlu1 %1185 }
 0x69d   : > { %v1187_v24 = vsub.f32 %v1183_v18, %v1186_v23 }
 0x69f   : > { %v1188_v25 = vmul.f32 1.442695, %v1187_v24 }
 0x6a0   : > { %v1295_v33 = vpop.permute.xlu1 %1294 }
 0x6a1   : > { %2279 = vpow2.f32 %v1188_v25  ;;  %v1300_v35 = vsel %vm819_vm3, %v1295_v33, 0  ;;  %v2265_v25 = vld [vmem:[%s3024_s19] sm:$0xff]  }
 0x6a4   : > { %v1293_v36 = vpop.permute.xlu1 %1292 }
 0x6ab   : > { %v2280_v26 = vpop.eup %2279 }
 0x6ac   : > { %v1190_v27 = vsel %vm819_vm3, %v2280_v26, 0.0 }
 0x6ad   : > { %1191 = vadd.xlane.f32.xlu0 %v1190_v27  ;;  %v2268_v27 = vld [vmem:[%s3030_s25 + $0x8] sm:$0xff]  }
 0x6c3   : > { %1196 = vrot.lane.b32.xlu0 %v3068_v11, %s2589_s22 }
 0x73a   : > { %v1192_v28 = vpop.xlane.xlu0 %1191 }
 0x73b   : > { %2281 = vrcp.f32 %v1192_v28 }
 0x73e   : > { %v1197_v29 = vpop.permute.xlu0 %1196 }
 0x73f   : > { %v1202_v30 = vsel %vm884_vm4, %v1197_v29, 0 }
 0x740   : > { %2079 = vmatpush3.bf16.msra.mxu0 %v1202_v30 }
 0x741   : > { %2090 = vmatprep.subr.bf16.mxu0 %v2578_v2 }
 0x745   : > { %v2282_v31 = vpop.eup %2281 }
 0x746   : > { %v1194_v32 = vmul.f32 %v2282_v31, %v2280_v26  ;;  %v2266_v26 = vld [vmem:[%s3024_s19 + $0x8] sm:$0xff]   ;;  %s3369_s19 = scalar_lea.vmem [#allocation8], %s2991_s9 }
 0x748   : > { %v1195_v34 = vpack.c.bf16 %v1194_v32, %v1194_v32  ;;  %v1970_v32 = vld [vmem:[%s3369_s19] ss:$0 sm:$0xff] }
 0x74a   : > { %2081 = vmatmul.mubr.msk.bf16.vlgmr.msra.gmra.mrb[12].mxu0 %vm819_vm3, %v1195_v34  ;;  %v1971_v34 = vld [vmem:[%s3370_s11] ss:$0 sm:$0xff] }
 0x74b   : > { %2091 = vmatpush3.bf16.xpose.msra.mxu0 %v1300_v35  ;;  %2092 = vmatprep.mubr.msk.bf16.mxu0 %vm2579_vm1, %v2578_v2 }
 0x74c   : > { %2102 = vmatprep.subr.bf16.mxu0 %v2578_v2 }
 0x752   : > { %2093 = vmatmul.mubr.msk.bf16.vlgmr.msra.gmra.mrb[16].mxu0 %vm819_vm3, %v1293_v36 }
 0x753   : > { %2104 = vmatprep.mubr.msk.bf16.mxu0 %vm2579_vm1, %v2578_v2  ;;  %2103 = vmatpush3.bf16.msra.mxu0 %v1408_v58 }
 0x754   : > { %2116 = vmatprep.subr.bf16.mxu0 %v2578_v2 }
 0x81d   : > { %v1238_v39 = vpop.f32.mrb[12].mxu0 }
 0x81e   : > { %v1244_v40 = vpack.c.bf16 %v1238_v39, %v1238_v39  ;;  %v2082_v41 = vpop.f32.mrb[13].mxu0  ;;  %v2270_v39 = vld [vmem:[%s3030_s25 + $0x18] sm:$0xff]  }
 0x81f   : > { %v1241_v42 = vpop.f32.mrb[14].mxu0 }
 0x820   : > { %v2083_v43 = vpop.f32.mrb[15].mxu0  ;;  %2087 = vmatmul.mubr.msk.bf16.vlgmr.msra.gmra.mrb[20].mxu1 %vm819_vm3, %v1244_v40  ;;  %v1972_v40 = vld [vmem:[%s611_s0] ss:$0 sm:$0xff] }
 0x821   : > { %2098 = vmatprep.mubr.msk.bf16.mxu1 %vm2579_vm1, %v2578_v2 }
 0x825   : > { %v1336_v44 = vpop.f32.mrb[16].mxu0 }
 0x826   : > { %v1342_v45 = vmul.f32 0.35355338, %v1336_v44  ;;  %v2094_v46 = vpop.f32.mrb[17].mxu0 }
 0x827   : > { %v1339_v47 = vpop.f32.mrb[18].mxu0 }
 0x828   : > { %v2095_v48 = vpop.f32.mrb[19].mxu0  ;;  %v1343_v49 = vsel %vm819_vm3, %v1342_v45, -inf }
 0x829   : > { %1344 = vmax.xlane.f32.xlu0 %v1343_v49  ;;  %v1976_v48 = vld [vmem:[%s727_s24] ss:$0 sm:$0xff] }
 0x83f   : > { %1355 = vrot.lane.b32.xlu0 %v3068_v11, %s2590_s14 }
 0x8b6   : > { %v1345_v50 = vpop.xlane.xlu0 %1344 }
 0x8b7   : > { %v1346_v51 = vsub.f32 %v1342_v45, %v1345_v50 }
 0x8b9   : > { %v1347_v52 = vmul.f32 1.442695, %v1346_v51 }
 0x8ba   : > { %v1356_v53 = vpop.permute.xlu0 %1355 }
 0x8bb   : > { %2283 = vpow2.f32 %v1347_v52  ;;  %v1361_v54 = vsel %vm884_vm4, %v1356_v53, 0 }
 0x8bc   : > { %2097 = vmatpush3.bf16.msra.mxu1 %v1361_v54 }
 0x8bd   : > { %2108 = vmatprep.subr.bf16.mxu1 %v2578_v2 }
 0x8c5   : > { %v2284_v55 = vpop.eup %2283 }
 0x8c6   : > { %v1349_v56 = vsel %vm819_vm3, %v2284_v55, 0.0 }
 0x8c7   : > { %1350 = vadd.xlane.f32.xlu1 %v1349_v56 }
 0x8f3   : > { %v1285_v11 = vpop.f32.mrb[20].mxu1 }
 0x8f4   : > { %v1291_v59 = vadd.f32 %v1285_v11, %v3119_v13  ;;  %v2088_v60 = vpop.f32.mrb[21].mxu1 }
 0x8f5   : > { %v1288_v61 = vpop.f32.mrb[22].mxu1 }
 0x8f6   : > { %v2089_v62 = vpop.f32.mrb[23].mxu1 }
 0x954   : > { %v1351_v63 = vpop.xlane.xlu1 %1350 }
 0x955   : > { %2285 = vrcp.f32 %v1351_v63  ;;  %v1982_v63 = vld [vmem:[%s730_s15] ss:$0 sm:$0xff] }
 0x95f   : > { %v2286_v0 = vpop.eup %2285 }
 0x960   : > { %v1353_v1 = vmul.f32 %v2286_v0, %v2284_v55 }
 0x962   : > { %v1354_v3 = vpack.c.bf16 %v1353_v1, %v1353_v1  ;;  %v1983_v1 = vld [vmem:[%s733_s2] ss:$0 sm:$0xff] }
 0x964   : > { %2099 = vmatmul.mubr.msk.bf16.vlgmr.msra.gmra.mrb[24].mxu1 %vm819_vm3, %v1354_v3 }
 0x965   : > { %2112 = vmatprep.mubr.msk.bf16.mxu1 %vm2579_vm1, %v2578_v2  ;;  %2109 = vmatpush3.bf16.msra.mxu1 %v2265_v25 }
 0x966   : > { %2110 = vmatprep.subr.bf16.mxu1 %v2578_v2 }
 0x969   : > { %2111 = vmatpush3.bf16.msra.mxu1 %v2266_v26 }
 0xa37   : > { %v1397_v5 = vpop.f32.mrb[24].mxu1 }
 0xa38   : > { %v1403_v6 = vpack.c.bf16 %v1397_v5, %v1397_v5  ;;  %v2100_v7 = vpop.f32.mrb[25].mxu1 }
 0xa39   : > { %v1400_v8 = vpop.f32.mrb[26].mxu1 }
 0xa3a   : > { %v2101_v9 = vpop.f32.mrb[27].mxu1  ;;  %2105 = vmatmul.mubr.msk.bf16.vlgmr.msra.gmra.mrb[20].mxu0 %vm819_vm3, %v1403_v6 }
 0xa3b   : > { %2124 = vmatprep.mubr.msk.bf16.mxu0 %vm2579_vm1, %v2578_v2 }
 0xb0d   : > { %v1444_v10 = vpop.f32.mrb[20].mxu0 }
 0xb0e   : > { %v1450_v13 = vadd.f32 %v1444_v10, %v1291_v59  ;;  %v2106_v14 = vpop.f32.mrb[21].mxu0 }
 0xb0f   : > { %v1447_v15 = vpop.f32.mrb[22].mxu0 }
 0xb10   : > { %v1458_v16 = vadd.f32 %v1969_v12, %v1450_v13  ;;  %v2107_v17 = vpop.f32.mrb[23].mxu0 }
 0xb12   : > { %v1459_v18 = vadd.f32 %v1458_v16, %v3052_v4  ;;  %v2267_v4 = vld [vmem:[%s3030_s25] sm:$0xff]  }
 0xb13   : > { %2117 = vmatpush3.bf16.msra.mxu0 %v2267_v4 }
 0xb14   : > { %v1460_v19 = vsel %vm767_vm2, %v1459_v18, 0.0  ;;  %2118 = vmatprep.subr.bf16.mxu0 %v2578_v2 }
 0xb15   : > { %1461 = vadd.xlane.f32.xlu1 %v1460_v19 }
 0xb17   : > { %2119 = vmatpush3.bf16.msra.mxu0 %v2268_v27 }
 0xb18   : > { %2120 = vmatprep.subr.bf16.mxu0 %v2578_v2 }
 0xb1b   : > { %2121 = vmatpush3.bf16.msra.mxu0 %v2269_v38 }
 0xb1c   : > { %2122 = vmatprep.subr.bf16.mxu0 %v2578_v2 }
 0xb1f   : > { %2123 = vmatpush3.bf16.msra.mxu0 %v2270_v39 }
 0xba2   : > { %v1462_v20 = vpop.xlane.xlu1 %1461 }
 0xba3   : > { %v1464_v21 = vmul.f32 0.03125, %v1462_v20 }
 0xba5   : > { %v1465_v22 = vsub.f32 %v1459_v18, %v1464_v21 }
 0xba7   : > { %v1466_v23 = vmul.f32 %v1465_v22, %v1465_v22 }
 0xba9   : > { %v1467_v24 = vsel %vm767_vm2, %v1466_v23, 0.0 }
 0xbaa   : > { %1468 = vadd.xlane.f32.xlu1 %v1467_v24 }
 0xc37   : > { %v1469_v28 = vpop.xlane.xlu1 %1468 }
 0xc38   : > { %v1470_v29 = vmul.f32 0.03125, %v1469_v28 }
 0xc3a   : > { %v1471_v30 = vadd.f32 1e-05, %v1470_v29 }
 0xc3c   : > { %2287 = vrsqrt.f32 %v1471_v30 }
 0xc46   : > { %v2288_v31 = vpop.eup %2287 }
 0xc47   : > { %v1473_v33 = vmul.f32 %v2288_v31, %v1465_v22 }
 0xc49   : > { %v1481_v35 = vmul.f32 %v1970_v32, %v1473_v33 }
 0xc4b   : > { %v1489_v36 = vadd.f32 %v1971_v34, %v1481_v35 }
 0xc4d   : > { %v1490_v37 = vpack.c.bf16 %v1489_v36, %v1489_v36 }
 0xc4f   : > { %2113 = vmatmul.mubr.msk.bf16.vlgmr.msra.gmra.mrb[28].mxu1 %vm767_vm2, %v1490_v37 }
 0xd22   : > { %v1551_v41 = vpop.f32.mrb[28].mxu1 }
 0xd23   : > { %v1552_v42 = vadd.f32 %v1972_v40, %v1551_v41  ;;  %v2114_v43 = vpop.f32.mrb[29].mxu1 }
 0xd24   : > { %v1554_v44 = vpop.f32.mrb[30].mxu1 }
 0xd25   : > { %v1557_v45 = vmax.f32 %v1552_v42, 0.0  ;;  %v2115_v46 = vpop.f32.mrb[31].mxu1 }
 0xd27   : > { %v1558_v47 = vpack.c.bf16 %v1557_v45, %v1557_v45 }
 0xd29   : > { %2125 = vmatmul.mubr.msk.bf16.vlgmr.msra.gmra.mrb[24].mxu0 %vm1598_vm5, %v1558_v47 }
 0xdfc   : > { %v1636_v49 = vpop.f32.mrb[24].mxu0 }
 0xdfd   : > { %v1637_v2 = vadd.f32 %v1976_v48, %v1636_v49  ;;  %v2126_v50 = vpop.f32.mrb[25].mxu0 }
 0xdfe   : > { %v1639_v51 = vpop.f32.mrb[26].mxu0 }
 0xdff   : > { %v2127_v52 = vpop.f32.mrb[27].mxu0  ;;  %v1642_v53 = vadd.f32 %v1637_v2, %v1489_v36 }
 0xe01   : > { %v1643_v54 = vsel %vm767_vm2, %v1642_v53, 0.0 }
 0xe02   : > { %1644 = vadd.xlane.f32.xlu1 %v1643_v54 }
 0xe8f   : > { %v1645_v55 = vpop.xlane.xlu1 %1644 }
 0xe90   : > { %v1646_v56 = vmul.f32 0.03125, %v1645_v55 }
 0xe92   : > { %v1647_v57 = vsub.f32 %v1642_v53, %v1646_v56 }
 0xe94   : > { %v1648_v58 = vmul.f32 %v1647_v57, %v1647_v57 }
 0xe96   : > { %v1649_v11 = vsel %vm767_vm2, %v1648_v58, 0.0 }
 0xe97   : > { %1650 = vadd.xlane.f32.xlu1 %v1649_v11 }
 0xf24   : > { %v1651_v59 = vpop.xlane.xlu1 %1650 }
 0xf25   : > { %v1652_v60 = vmul.f32 0.03125, %v1651_v59 }
 0xf27   : > { %v1653_v61 = vadd.f32 1e-05, %v1652_v60 }
 0xf29   : > { %2289 = vrsqrt.f32 %v1653_v61 }
 0xf33   : > { %v2290_v62 = vpop.eup %2289 }
 0xf34   : > { %v1655_v0 = vmul.f32 %v2290_v62, %v1647_v57  ;;  %1676 = sbr.rel (%p1984_p7) target bundleno = 3899 (0xf3b), region = 100 }
 0xf36   : > { %v1663_v3 = vmul.f32 %v1982_v63, %v1655_v0 }
 0xf38   : > { %v1671_v5 = vadd.f32 %v1983_v1, %v1663_v3 }
 0xf3a   : > { %1672 = vst.msk [vmem:[#allocation2] sm:$0xff] %vm767_vm2, %v1671_v5  ;;  %1677 = vst.msk [vmem:[%s3045_s12] sm:$0xff] (!%p1984_p7), %vm767_vm2, %v1671_v5 }
 0xf3b PF: > { %s3375_s29 = sld [smem:[#allocation23_spill]]  ;;  %s3376_s7 = sld [smem:[#allocation45_spill]] }
 0xf3c   : > { %s1692_s27 = sshll.u32 %s3045_s12, 4  ;;  %s1679_s1 = scalar_lea.sflag [#allocation5], %s2981_s16  ;;  %s1693_s27 = int_to_ptr.vmem [resolvable:$true] %s1692_s27 }
 0xf3d   : > { %s2441_s13 = scalar_lea.vmem %s1693_s27, 128  ;;  %p3377_p13 = scmp.ne.s32.totalorder %s3342_s23, 0 }
 0xf3e   : > { %p2442_p12 = scmp.ne.s32.totalorder %s1693_s27, %s2441_s13  ;;  %s2591_s6 = smov [#allocation12]  }
 0xf3f   : > { %s2445_s20 = sshll.u32 %s2591_s6, 4  ;;  %s2446_s20 = int_to_ptr.vmem [resolvable:$false] %s2445_s20 }
 0xf40   : > { %p2443_p0 = pnand %p2442_p12, %p3377_p13  ;;  %s2447_s17 = scalar_lea.vmem %s2446_s20, 256 }
 0xf41   : > { %s1986_s15 = sshll.u32 %s3375_s29, 7  ;;  %p2448_p1 = scmp.lt.s32.totalorder %s1693_s27, %s2446_s20 }
 0xf42   : > { %s3204_s2 = scalar_lea.hbm %s3376_s7, %s1986_s15  ;;  %p2444_p4 = pneg %p2443_p0 }
 0xf43   : > { %p2449_p3 = scmp.lt.s32.totalorder %s2447_s17, %s2441_s13 }
 0xf45   : > { %p2450_p5 = por %p2449_p3, %p2448_p1 }
 0xf47   : > { %p2451_p10 = pnand %p2450_p5, %p2444_p4 }
 0xf49   : > { %2454 = shalt.err (!%p2451_p10)
}
 0xf4a   : > { %s2455_s16 = scalar_lea.hbm %s3204_s2, 128  ;;  %s2459_s14 = scalar_lea.hbm %s3376_s7, 256 }
 0xf4b   : > { %p2456_p8 = scmp.ne.s32.totalorder %s3204_s2, %s2455_s16  ;;  %p2460_p2 = scmp.lt.u32.totalorder %s3204_s2, %s3376_s7 }
 0xf4c   : > { %p2461_p6 = scmp.lt.u32.totalorder %s2459_s14, %s2455_s16  ;;  %p2463_p12 = scmp.lt.u32.totalorder %s2455_s16, %s3204_s2 }
 0xf4d   : > { %p2457_p11 = pnand %p2456_p8, %p3377_p13 }
 0xf4e   : > { %p2462_p7 = por %p2461_p6, %p2460_p2 }
 0xf4f   : > { %p2458_p9 = pneg %p2457_p11 }
 0xf50   : > { %p2464_p0 = por %p2463_p12, %p2462_p7 }
 0xf52   : > { %p2465_p4 = pnand %p2464_p0, %p2458_p9 }
 0xf54   : > { %2468 = shalt.err (!%p2465_p4)
}
 0xf55   : > { %2138 = dma.vmem_to_hbm [thread:$0]  (%p3377_p13), %s1693_s27, 128, %s3204_s2, %s1679_s1  }
 0xf56 PF: > { %s3378_s11 = sld [smem:[#allocation19_spill]]  ;;  %s3379_s3 = sld [smem:[#allocation31_spill]] }
 0xf57   : > { %p2161_p1 = scmp.ge.s32.totalorder %s2571_s18, 2 }
 0xf5c   : > { %s1704_s21 = sand.u32 1, %s3378_s11   ;;  %p3380_p3 = scmp.ne.s32.totalorder %s3379_s3, 0 }
 0xf5d   : > { %s1705_s5 = scalar_lea.sflag [#allocation5], %s1704_s21 }
 0xf5e   : > { %p2157_p5 = pnand %p2161_p1, %p3380_p3 }
 0xf60   : > { %2526 = dma.done.wait (!%p2157_p5), %s1705_s5, 128  }
 0xf61   : > { %2528 = vsyncadd (!%p2157_p5), %s1705_s5, 4294967168  ;;  %s35_s18 = sadd.s32 1, %s2571_s18   ;;  %s3381_s25 = sld [smem:[#allocation17_spill]] }
 0xf62   : > { %p32_p10 = scmp.ge.s32.totalorder %s35_s18, 6   ;;  %s3382_s26 = sld [smem:[#allocation18_spill]] }
 0xf63   : > { %s3383_s27 = sld [smem:[#allocation27_spill]]  ;;  %s3384_s28 = sld [smem:[#allocation20_spill]] }
 0xf64   : > { %s3385_s29 = sld [smem:[#allocation21_spill]]  ;;  %s3386_s30 = sld [smem:[#allocation30_spill]] }
 0xf65   : > { %s3387_s14 = sld [smem:[#allocation24_spill]]  ;;  %s3388_s15 = sld [smem:[#allocation25_spill]] }
 0xf66   : > { %s3389_s16 = sld [smem:[#allocation26_spill]]  ;;  %s3390_s17 = sld [smem:[#allocation28_spill]] }
 0xf67   :  { %34 = sbr.rel (!%p32_p10) target bundleno = 28 (0x1c), region = 197 }
 0xf6e   :  { %1710 = vsyncpa [#allocation4], 1 }
 0xf6f   :  { %1712 = vsyncpa [#allocation4 + $0x1], 1 }
 0xf70   :  { %1713 = vsyncpa [#allocation7], 1 }
 0xf71   :  { %1715 = vsyncpa [#allocation7 + $0x1], 1 }
 0xf72   :  { %1716 = vsyncpa [#allocation10], 1 }
 0xf73   :  { %1718 = vsyncpa [#allocation10 + $0x1], 1 }
 0xf74   :  { %1719 = vsyncpa [#allocation5], 1 }
 0xf75   :  { %1721 = vsyncpa [#allocation5 + $0x1], 1 }

</bundles_post_ra>
